<compile_context>
chip_gen: v7x
topology: tpu7x:2x2x1
jax: 0.10.0
libtpu: 0.0.40
codegen_flags: <defaults>
</compile_context>

<pallas_src>
import math
import functools

import jax
import jax.numpy as jnp
from jax import lax
from jax.experimental import pallas as pl
from jax.experimental.pallas import tpu as pltpu

_LN_EPS = 1e-5      # torch.nn.LayerNorm default
_NEG_INF = -1e30    # masked_softmax fill value


# ----------------------------------------------------------------------------------
# shared in-kernel helpers
# ----------------------------------------------------------------------------------
def _layer_norm(x, gamma, beta):
    # x: (S, H) f32 ; gamma/beta: (1, H)
    mean = jnp.mean(x, axis=-1, keepdims=True)
    cent = x - mean
    var = jnp.mean(cent * cent, axis=-1, keepdims=True)
    return cent * lax.rsqrt(var + _LN_EPS) * gamma.astype(jnp.float32) + beta.astype(jnp.float32)


# ----------------------------------------------------------------------------------
# Positional encoding buffer (exact PyTorch layout: row 0 is all zeros)
# ----------------------------------------------------------------------------------
def make_pe_buffer(hidden_size, para_limit=1000):
    pe = jnp.zeros((para_limit + 1, hidden_size), dtype=jnp.float32)
    position = jnp.arange(0, para_limit, dtype=jnp.float32)[:, None]
    div_term = jnp.exp(jnp.arange(0, hidden_size, 2, dtype=jnp.float32)
                       * (-math.log(10000.0) / hidden_size))
    pe = pe.at[1:, 0::2].set(jnp.sin(position * div_term))
    pe = pe.at[1:, 1::2].set(jnp.cos(position * div_term))
    return pe


# ----------------------------------------------------------------------------------
# Kernel 1: PositionalEncoding + n_conv ConvBlocks fused (one grid step per batch elem)
# ----------------------------------------------------------------------------------
def _pe_convs_kernel(*refs, n_conv, kernel_size, scale_fact, has_pe_mask):
    idx = 0
    x_ref = refs[idx]; idx += 1
    pe_ref = refs[idx]; idx += 1
    pm_ref = None
    if has_pe_mask:
        pm_ref = refs[idx]; idx += 1
    conv_refs = refs[idx: idx + 6 * n_conv]; idx += 6 * n_conv
    o_ref = refs[idx]

    cdt = x_ref.dtype                                     # MXU operand dtype (bf16 stays bf16)
    x = x_ref[...].astype(jnp.float32)                    # (S, H)
    if scale_fact != 1.0:
        x = x * scale_fact
    pe = pe_ref[...].astype(jnp.float32)
    if has_pe_mask:
        pe = pe * pm_ref[...].astype(jnp.float32)         # (S, 1) splat over lanes
    out = x + pe

    S = out.shape[0]
    pad = kernel_size // 2
    row = lax.broadcasted_iota(jnp.int32, (S, 1), 0)

    for c in range(n_conv):                               # static, unrolled conv stack
        g_ref, be_ref, wdw_ref, bdw_ref, wpw_ref, bpw_ref = conv_refs[6 * c: 6 * c + 6]
        norm = _layer_norm(out, g_ref[...], be_ref[...])

        # depthwise conv over the sequence axis (cross-correlation, zero padding),
        # expressed with sublane rolls + iota masks (correct: block spans full S).
        acc = jnp.zeros_like(norm)
        for j in range(kernel_size):                      # static tap loop
            d = j - pad                                   # contribution from norm[s + d]
            if d == 0:
                shifted = norm
            else:
                shifted = pltpu.roll(norm, shift=(-d) % S, axis=0)
                valid = (row + d >= 0) & (row + d < S)
                shifted = jnp.where(valid, shifted, 0.0)
            acc = acc + shifted * wdw_ref[j].astype(jnp.float32)   # (1, H) tap weights
        dw = acc + bdw_ref[...].astype(jnp.float32)

        # pointwise conv == channel matmul (MXU in input dtype), relu, residual
        pw = jnp.dot(dw.astype(cdt), wpw_ref[...].astype(cdt),
                     preferred_element_type=jnp.float32) + bpw_ref[...].astype(jnp.float32)
        out = out + jnp.maximum(pw, 0.0)

    o_ref[...] = out.astype(o_ref.dtype)


def pe_convs(x, pe, conv_params, *, kernel_size, pe_mask=None, scale=False):
    B, S, H = x.shape
    n_conv = len(conv_params)
    scale_fact = float(H) ** 0.5 if scale else 1.0
    # pe[:S] includes the all-zeros row 0 — matches self.pe[:, :x.size(1), :] exactly.
    pe_slice = pe[:S, :].astype(x.dtype)

    x_spec = pl.BlockSpec((None, S, H), lambda b: (b, 0, 0))
    row_spec = pl.BlockSpec((1, H), lambda b: (0, 0))

    in_specs = [x_spec, pl.BlockSpec((S, H), lambda b: (0, 0))]
    operands = [x, pe_slice]
    if pe_mask is not None:
        m3 = pe_mask.astype(x.dtype).reshape(B, S, 1)       # S on sublanes, lane splat over H
        in_specs.append(pl.BlockSpec((None, S, 1), lambda b: (b, 0, 0)))
        operands.append(m3)
    for cp in conv_params:
        in_specs += [row_spec, row_spec,
                     pl.BlockSpec((kernel_size, 1, H), lambda b: (0, 0, 0)),
                     row_spec,
                     pl.BlockSpec((H, H), lambda b: (0, 0)),
                     row_spec]
        operands += [cp["ln_g"], cp["ln_b"], cp["w_dw"], cp["b_dw"], cp["w_pw"], cp["b_pw"]]

    kern = functools.partial(_pe_convs_kernel, n_conv=n_conv, kernel_size=kernel_size,
                             scale_fact=scale_fact, has_pe_mask=pe_mask is not None)
    return pl.pallas_call(
        kern,
        out_shape=jax.ShapeDtypeStruct((B, S, H), x.dtype),
        grid_spec=pltpu.PrefetchScalarGridSpec(
            num_scalar_prefetch=0,
            grid=(B,),
            in_specs=in_specs,
            out_specs=pl.BlockSpec((None, S, H), lambda b: (b, 0, 0))),
        compiler_params=pltpu.CompilerParams(dimension_semantics=("parallel",)),
    )(*operands)


# ----------------------------------------------------------------------------------
# Kernel 2: SelfAttentionBlock + FeedForwardBlock fused (one grid step per batch elem)
# ----------------------------------------------------------------------------------
def _att_ff_kernel(*refs, n_head, has_mask):
    idx = 0
    x_ref = refs[idx]; idx += 1
    m_ref = None
    if has_mask:
        m_ref = refs[idx]; idx += 1
    (lng_a, lnb_a, wqkv_ref, bqkv_ref, wout_ref, bout_ref,
     lng_f, lnb_f, wff_ref, bff_ref) = refs[idx: idx + 10]
    o_ref = refs[idx + 10]

    cdt = x_ref.dtype
    x = x_ref[...].astype(jnp.float32)                    # (S, H)
    S, H = x.shape
    d_k = H // n_head
    scale = float(d_k) ** 0.5

    # ---- LayerNorm -> combined QKV projection (resident (S, 3H) slab) ----
    norm = _layer_norm(x, lng_a[...], lnb_a[...])
    qkv = jnp.dot(norm.astype(cdt), wqkv_ref[...].astype(cdt),
                  preferred_element_type=jnp.float32) + bqkv_ref[...].astype(jnp.float32)

    mask_row = m_ref[...].astype(jnp.float32) if has_mask else None   # (1, S), keys on lanes

    # ---- per-head attention: static loop, lane-axis slices, lane-dense context ----
    ctx_heads = []
    for h in range(n_head):
        q = qkv[:, h * d_k:(h + 1) * d_k]
        k = qkv[:, H + h * d_k: H + (h + 1) * d_k]
        v = qkv[:, 2 * H + h * d_k: 2 * H + (h + 1) * d_k]
        s = lax.dot_general(q.astype(cdt), k.astype(cdt), (((1,), (1,)), ((), ())),
                            preferred_element_type=jnp.float32) / scale        # (S, S)
        if mask_row is not None:
            s = jnp.where(mask_row > 0.0, s, _NEG_INF)                          # masked_softmax
        s = s - jnp.max(s, axis=-1, keepdims=True)
        p = jnp.exp(s)
        p = p * pl.reciprocal(jnp.sum(p, axis=-1, keepdims=True), approx=True)  # EUP, not VALU
        ctx_heads.append(jnp.dot(p.astype(cdt), v.astype(cdt),
                                 preferred_element_type=jnp.float32))           # (S, d_k)
    ctx = jnp.concatenate(ctx_heads, axis=-1)              # (S, H) lane-dense, no HBM roundtrip

    # ---- output projection + residual ----
    att = jnp.dot(ctx.astype(cdt), wout_ref[...].astype(cdt),
                  preferred_element_type=jnp.float32) + bout_ref[...].astype(jnp.float32)
    out = x + att

    # ---- FeedForwardBlock: LayerNorm -> Linear -> relu -> residual ----
    norm_f = _layer_norm(out, lng_f[...], lnb_f[...])
    proj = jnp.dot(norm_f.astype(cdt), wff_ref[...].astype(cdt),
                   preferred_element_type=jnp.float32) + bff_ref[...].astype(jnp.float32)
    out = out + jnp.maximum(proj, 0.0)

    o_ref[...] = out.astype(o_ref.dtype)


def attention_ff(x, att_params, ff_params, *, n_head, mask=None):
    B, S, H = x.shape
    row_h = pl.BlockSpec((1, H), lambda b: (0, 0))

    in_specs = [pl.BlockSpec((None, S, H), lambda b: (b, 0, 0))]
    operands = [x]
    if mask is not None:
        m = mask.astype(jnp.float32).reshape(B, 1, S)       # keys on lanes
        in_specs.append(pl.BlockSpec((None, 1, S), lambda b: (b, 0, 0)))
        operands.append(m)
    in_specs += [row_h, row_h,
                 pl.BlockSpec((H, 3 * H), lambda b: (0, 0)),
                 pl.BlockSpec((1, 3 * H), lambda b: (0, 0)),
                 pl.BlockSpec((H, H), lambda b: (0, 0)),
                 row_h,
                 row_h, row_h,
                 pl.BlockSpec((H, H), lambda b: (0, 0)),
                 row_h]
    operands += [att_params["ln_g"], att_params["ln_b"],
                 att_params["w_qkv"], att_params["b_qkv"],
                 att_params["w_out"], att_params["b_out"],
                 ff_params["ln_g"], ff_params["ln_b"], ff_params["w"], ff_params["b"]]

    kern = functools.partial(_att_ff_kernel, n_head=n_head, has_mask=mask is not None)
    return pl.pallas_call(
        kern,
        out_shape=jax.ShapeDtypeStruct((B, S, H), x.dtype),
        grid_spec=pltpu.PrefetchScalarGridSpec(
            num_scalar_prefetch=0,
            grid=(B,),
            in_specs=in_specs,
            out_specs=pl.BlockSpec((None, S, H), lambda b: (b, 0, 0))),
        compiler_params=pltpu.CompilerParams(dimension_semantics=("parallel",)),
    )(*operands)


# ----------------------------------------------------------------------------------
# Full EncoderBlock forward (eval mode): exactly 2 pallas_calls
# ----------------------------------------------------------------------------------
@functools.partial(jax.jit, static_argnames=("n_head", "kernel_size", "mask_pos"))
def encoder_block_forward(x, params, mask=None, *, n_head, kernel_size, mask_pos=False):
    out = pe_convs(x, params["pe"], params["convs"], kernel_size=kernel_size,
                   pe_mask=mask if mask_pos else None, scale=False)
    out = attention_ff(out, params["att"], params["ff"], n_head=n_head, mask=mask)
    return out


def init_encoder_block_params(key, hidden_size, n_conv, kernel_size, para_limit=1000,
                              w_scale=0.05):
    keys = iter(jax.random.split(key, 64))

    def rnd(shape):
        return jax.random.normal(next(keys), shape, jnp.float32) * w_scale

    params = {"pe": make_pe_buffer(hidden_size, para_limit), "convs": []}
    for _ in range(n_conv):
        params["convs"].append(dict(
            ln_g=1.0 + rnd((1, hidden_size)), ln_b=rnd((1, hidden_size)),
            w_dw=rnd((kernel_size, 1, hidden_size)), b_dw=rnd((1, hidden_size)),
            w_pw=rnd((hidden_size, hidden_size)), b_pw=rnd((1, hidden_size))))
    params["att"] = dict(
        ln_g=1.0 + rnd((1, hidden_size)), ln_b=rnd((1, hidden_size)),
        w_qkv=rnd((hidden_size, 3 * hidden_size)), b_qkv=rnd((1, 3 * hidden_size)),
        w_out=rnd((hidden_size, hidden_size)), b_out=rnd((1, hidden_size)))
    params["ff"] = dict(
        ln_g=1.0 + rnd((1, hidden_size)), ln_b=rnd((1, hidden_size)),
        w=rnd((hidden_size, hidden_size)), b=rnd((1, hidden_size)))
    return params


# ----------------------------------------------------------------------------------
# Pure-JAX reference (mirrors the PyTorch eval-mode forward)
# ----------------------------------------------------------------------------------
_PREC = lax.Precision.HIGHEST


def _layer_norm_ref(x, g, b):
    mean = jnp.mean(x, axis=-1, keepdims=True)
    var = jnp.mean((x - mean) ** 2, axis=-1, keepdims=True)
    return (x - mean) * lax.rsqrt(var + _LN_EPS) * g + b


def _reference_encoder_block(x, params, mask, *, n_head, kernel_size, mask_pos=False):
    B, S, H = x.shape
    pe = params["pe"][:S][None]
    if mask_pos and mask is not None:
        out = x + pe * mask.astype(x.dtype)[:, :, None]
    else:
        out = x + pe

    pad = kernel_size // 2
    for cp in params["convs"]:
        norm = _layer_norm_ref(out, cp["ln_g"], cp["ln_b"])
        padded = jnp.pad(norm, ((0, 0), (pad, pad), (0, 0)))
        dw = sum(padded[:, j:j + S, :] * cp["w_dw"][j] for j in range(kernel_size)) + cp["b_dw"]
        pw = jnp.einsum("bsh,ho->bso", dw, cp["w_pw"], precision=_PREC) + cp["b_pw"]
        out = out + jnp.maximum(pw, 0.0)

    ap = params["att"]
    norm = _layer_norm_ref(out, ap["ln_g"], ap["ln_b"])
    qkv = jnp.einsum("bsh,hn->bsn", norm, ap["w_qkv"], precision=_PREC) + ap["b_qkv"]
    d_k = H // n_head
    q, k, v = qkv[..., :H], qkv[..., H:2 * H], qkv[..., 2 * H:]

    def heads(t):
        return t.reshape(B, S, n_head, d_k).transpose(0, 2, 1, 3)

    qh, kh, vh = heads(q), heads(k), heads(v)
    scores = jnp.einsum("bhqd,bhkd->bhqk", qh, kh, precision=_PREC) / (d_k ** 0.5)
    if mask is not None:
        m = mask.astype(jnp.float32)[:, None, None, :]
        scores = jnp.where(m > 0, scores, _NEG_INF)
    probs = jax.nn.softmax(scores, axis=-1)
    ctx = jnp.einsum("bhqk,bhkd->bhqd", probs, vh, precision=_PREC)
    ctx = ctx.transpose(0, 2, 1, 3).reshape(B, S, H)
    att = jnp.einsum("bsh,ho->bso", ctx, ap["w_out"], precision=_PREC) + ap["b_out"]
    out = out + att

    fp = params["ff"]
    norm = _layer_norm_ref(out, fp["ln_g"], fp["ln_b"])
    proj = jnp.einsum("bsh,ho->bso", norm, fp["w"], precision=_PREC) + fp["b"]
    return out + jnp.maximum(proj, 0.0)


# ----------------------------------------------------------------------------------
if __name__ == "__main__":
    key = jax.random.PRNGKey(0)
    B, S, H = 2, 8, 32
    n_head = 4
    n_conv = 2
    kernel_size = 5
    para_limit = 64

    k_x, k_p = jax.random.split(key)
    x = jax.random.normal(k_x, (B, S, H), dtype=jnp.float32)
    lengths = jnp.array([6, 3], dtype=jnp.int32)
    mask = jnp.arange(S)[None, :] < lengths[:, None]           # (B, S) bool

    params = init_encoder_block_params(k_p, H, n_conv, kernel_size, para_limit)

    # 1) default EncoderBlock path: mask_pos=False (unmasked PE) + masked attention
    out = encoder_block_forward(x, params, mask=mask, n_head=n_head,
                                kernel_size=kernel_size, mask_pos=False)
    out = jax.block_until_ready(out)
    ref = _reference_encoder_block(x, params, mask, n_head=n_head,
                                   kernel_size=kernel_size, mask_pos=False)
    assert out.shape == (B, S, H)
    assert jnp.allclose(out, ref, atol=1e-2, rtol=1e-2), \
        f"default path mismatch: max abs err {jnp.max(jnp.abs(out - ref))}"

    # 2) mask_pos=True path (masked positional encoding)
    out2 = encoder_block_forward(x, params, mask=mask, n_head=n_head,
                                 kernel_size=kernel_size, mask_pos=True)
    out2 = jax.block_until_ready(out2)
    ref2 = _reference_encoder_block(x, params, mask, n_head=n_head,
                                    kernel_size=kernel_size, mask_pos=True)
    assert jnp.allclose(out2, ref2, atol=1e-2, rtol=1e-2), \
        f"mask_pos path mismatch: max abs err {jnp.max(jnp.abs(out2 - ref2))}"

    # 3) mask=None path (specialized no-mask kernels)
    out3 = encoder_block_forward(x, params, mask=None, n_head=n_head,
                                 kernel_size=kernel_size)
    out3 = jax.block_until_ready(out3)
    ref3 = _reference_encoder_block(x, params, None, n_head=n_head,
                                    kernel_size=kernel_size)
    assert jnp.allclose(out3, ref3, atol=1e-2, rtol=1e-2), \
        f"no-mask path mismatch: max abs err {jnp.max(jnp.abs(out3 - ref3))}"

    print("KERNEL_OK")
</pallas_src>

<mosaic_0001>
module attributes {stable_mosaic.version = 11 : i64} {
  func.func @_att_ff_kernel(%arg0: i32, %arg1: memref<1x8x32xf32, #tpu.memory_space<vmem>>, %arg2: memref<1x1x8xf32, #tpu.memory_space<vmem>>, %arg3: memref<1x32xf32, #tpu.memory_space<vmem>>, %arg4: memref<1x32xf32, #tpu.memory_space<vmem>>, %arg5: memref<32x96xf32, #tpu.memory_space<vmem>>, %arg6: memref<1x96xf32, #tpu.memory_space<vmem>>, %arg7: memref<32x32xf32, #tpu.memory_space<vmem>>, %arg8: memref<1x32xf32, #tpu.memory_space<vmem>>, %arg9: memref<1x32xf32, #tpu.memory_space<vmem>>, %arg10: memref<1x32xf32, #tpu.memory_space<vmem>>, %arg11: memref<32x32xf32, #tpu.memory_space<vmem>>, %arg12: memref<1x32xf32, #tpu.memory_space<vmem>>, %arg13: memref<1x8x32xf32, #tpu.memory_space<vmem>>) attributes {dimension_semantics = [#tpu.dimension_semantics<parallel>], iteration_bounds = array<i64: 2>, scalar_prefetch = 0 : i64, scratch_operands = 0 : i64, tpu.core_type = #tpu.core_type<tc>, window_params = [{transform_indices = @transform_0, window_bounds = array<i64: 1, 8, 32>}, {transform_indices = @transform_1, window_bounds = array<i64: 1, 1, 8>}, {pipeline_mode = #tpu.pipeline_mode<synchronous>, transform_indices = @transform_2, window_bounds = array<i64: 1, 32>}, {pipeline_mode = #tpu.pipeline_mode<synchronous>, transform_indices = @transform_3, window_bounds = array<i64: 1, 32>}, {pipeline_mode = #tpu.pipeline_mode<synchronous>, transform_indices = @transform_4, window_bounds = array<i64: 32, 96>}, {pipeline_mode = #tpu.pipeline_mode<synchronous>, transform_indices = @transform_5, window_bounds = array<i64: 1, 96>}, {pipeline_mode = #tpu.pipeline_mode<synchronous>, transform_indices = @transform_6, window_bounds = array<i64: 32, 32>}, {pipeline_mode = #tpu.pipeline_mode<synchronous>, transform_indices = @transform_7, window_bounds = array<i64: 1, 32>}, {pipeline_mode = #tpu.pipeline_mode<synchronous>, transform_indices = @transform_8, window_bounds = array<i64: 1, 32>}, {pipeline_mode = #tpu.pipeline_mode<synchronous>, transform_indices = @transform_9, window_bounds = array<i64: 1, 32>}, {pipeline_mode = #tpu.pipeline_mode<synchronous>, transform_indices = @transform_10, window_bounds = array<i64: 32, 32>}, {pipeline_mode = #tpu.pipeline_mode<synchronous>, transform_indices = @transform_11, window_bounds = array<i64: 1, 32>}, {transform_indices = @transform_12, window_bounds = array<i64: 1, 8, 32>}]} {
    %c0 = arith.constant 0 : index
    %c0_0 = arith.constant 0 : index
    %c0_1 = arith.constant 0 : index
    %0 = vector.load %arg1[%c0, %c0_0, %c0_1] : memref<1x8x32xf32, #tpu.memory_space<vmem>>, vector<1x8x32xf32>
    %1 = vector.shape_cast %0 : vector<1x8x32xf32> to vector<8x32xf32>
    %c0_2 = arith.constant 0 : index
    %c0_3 = arith.constant 0 : index
    %2 = vector.load %arg3[%c0_2, %c0_3] : memref<1x32xf32, #tpu.memory_space<vmem>>, vector<1x32xf32>
    %c0_4 = arith.constant 0 : index
    %c0_5 = arith.constant 0 : index
    %3 = vector.load %arg4[%c0_4, %c0_5] : memref<1x32xf32, #tpu.memory_space<vmem>>, vector<1x32xf32>
    %cst = arith.constant dense<0.000000e+00> : vector<8xf32>
    %4 = vector.multi_reduction <add>, %1, %cst [1] : vector<8x32xf32> to vector<8xf32>
    %5 = vector.shape_cast %4 : vector<8xf32> to vector<8x1xf32>
    %cst_6 = arith.constant 3.200000e+01 : f32
    %6 = vector.broadcast %cst_6 : f32 to vector<8x1xf32>
    %7 = arith.divf %5, %6 : vector<8x1xf32>
    %8 = vector.broadcast %7 : vector<8x1xf32> to vector<8x32xf32>
    %9 = arith.subf %1, %8 : vector<8x32xf32>
    %10 = arith.mulf %9, %9 : vector<8x32xf32>
    %cst_7 = arith.constant dense<0.000000e+00> : vector<8xf32>
    %11 = vector.multi_reduction <add>, %10, %cst_7 [1] : vector<8x32xf32> to vector<8xf32>
    %12 = vector.shape_cast %11 : vector<8xf32> to vector<8x1xf32>
    %cst_8 = arith.constant 3.200000e+01 : f32
    %13 = vector.broadcast %cst_8 : f32 to vector<8x1xf32>
    %14 = arith.divf %12, %13 : vector<8x1xf32>
    %cst_9 = arith.constant 9.99999974E-6 : f32
    %15 = vector.broadcast %cst_9 : f32 to vector<8x1xf32>
    %16 = arith.addf %14, %15 : vector<8x1xf32>
    %17 = math.rsqrt %16 : vector<8x1xf32>
    %18 = vector.broadcast %17 : vector<8x1xf32> to vector<8x32xf32>
    %19 = arith.mulf %9, %18 : vector<8x32xf32>
    %20 = vector.broadcast %2 : vector<1x32xf32> to vector<8x32xf32>
    %21 = arith.mulf %19, %20 : vector<8x32xf32>
    %22 = vector.broadcast %3 : vector<1x32xf32> to vector<8x32xf32>
    %23 = arith.addf %21, %22 : vector<8x32xf32>
    %c0_10 = arith.constant 0 : index
    %c0_11 = arith.constant 0 : index
    %24 = vector.load %arg5[%c0_10, %c0_11] : memref<32x96xf32, #tpu.memory_space<vmem>>, vector<32x96xf32>
    %cst_12 = arith.constant dense<0.000000e+00> : vector<8x96xf32>
    %25 = tpu.matmul %23, %24, %cst_12 {dimension_numbers = #tpu.dot_dimension_numbers<[1], [0], [0], [1], [0, 0, 1, 1], [], []>} : vector<8x32xf32>, vector<32x96xf32>, vector<8x96xf32> -> vector<8x96xf32>
    %c0_13 = arith.constant 0 : index
    %c0_14 = arith.constant 0 : index
    %26 = vector.load %arg6[%c0_13, %c0_14] : memref<1x96xf32, #tpu.memory_space<vmem>>, vector<1x96xf32>
    %27 = vector.broadcast %26 : vector<1x96xf32> to vector<8x96xf32>
    %28 = arith.addf %25, %27 : vector<8x96xf32>
    %c0_15 = arith.constant 0 : index
    %c0_16 = arith.constant 0 : index
    %c0_17 = arith.constant 0 : index
    %29 = vector.load %arg2[%c0_15, %c0_16, %c0_17] : memref<1x1x8xf32, #tpu.memory_space<vmem>>, vector<1x1x8xf32>
    %30 = vector.shape_cast %29 : vector<1x1x8xf32> to vector<1x8xf32>
    %31 = vector.extract_strided_slice %28 {offsets = [0, 0], sizes = [8, 8], strides = [1, 1]} : vector<8x96xf32> to vector<8x8xf32>
    %32 = vector.extract_strided_slice %28 {offsets = [0, 32], sizes = [8, 8], strides = [1, 1]} : vector<8x96xf32> to vector<8x8xf32>
    %33 = vector.extract_strided_slice %28 {offsets = [0, 64], sizes = [8, 8], strides = [1, 1]} : vector<8x96xf32> to vector<8x8xf32>
    %cst_18 = arith.constant dense<0.000000e+00> : vector<8x8xf32>
    %34 = tpu.matmul %31, %32, %cst_18 {dimension_numbers = #tpu.dot_dimension_numbers<[1], [1], [0], [0], [0, 0, 1, 0], [], []>} : vector<8x8xf32>, vector<8x8xf32>, vector<8x8xf32> -> vector<8x8xf32>
    %cst_19 = arith.constant 2.82842708 : f32
    %35 = vector.broadcast %cst_19 : f32 to vector<8x8xf32>
    %36 = arith.divf %34, %35 : vector<8x8xf32>
    %cst_20 = arith.constant 0.000000e+00 : f32
    %37 = vector.broadcast %cst_20 : f32 to vector<1x8xf32>
    %38 = arith.cmpf ogt, %30, %37 : vector<1x8xf32>
    %cst_21 = arith.constant -1.000000e+30 : f32
    %39 = vector.shape_cast %38 : vector<1x8xi1> to vector<1x8xi1>
    %40 = vector.broadcast %39 : vector<1x8xi1> to vector<8x8xi1>
    %41 = vector.broadcast %cst_21 : f32 to vector<8x8xf32>
    %42 = arith.select %40, %36, %41 : vector<8x8xi1>, vector<8x8xf32>
    %cst_22 = arith.constant dense<0xFF800000> : vector<8xf32>
    %43 = vector.multi_reduction <maximumf>, %42, %cst_22 [1] : vector<8x8xf32> to vector<8xf32>
    %44 = vector.shape_cast %43 : vector<8xf32> to vector<8x1xf32>
    %45 = vector.broadcast %44 : vector<8x1xf32> to vector<8x8xf32>
    %46 = arith.subf %42, %45 : vector<8x8xf32>
    %47 = math.exp %46 : vector<8x8xf32>
    %cst_23 = arith.constant dense<0.000000e+00> : vector<8xf32>
    %48 = vector.multi_reduction <add>, %47, %cst_23 [1] : vector<8x8xf32> to vector<8xf32>
    %49 = vector.shape_cast %48 : vector<8xf32> to vector<8x1xf32>
    %50 = tpu.reciprocal %49 {approx = true} : vector<8x1xf32> -> vector<8x1xf32>
    %51 = vector.broadcast %50 : vector<8x1xf32> to vector<8x8xf32>
    %52 = arith.mulf %47, %51 : vector<8x8xf32>
    %cst_24 = arith.constant dense<0.000000e+00> : vector<8x8xf32>
    %53 = tpu.matmul %52, %33, %cst_24 {dimension_numbers = #tpu.dot_dimension_numbers<[1], [0], [0], [1], [0, 0, 1, 1], [], []>} : vector<8x8xf32>, vector<8x8xf32>, vector<8x8xf32> -> vector<8x8xf32>
    %54 = vector.extract_strided_slice %28 {offsets = [0, 8], sizes = [8, 8], strides = [1, 1]} : vector<8x96xf32> to vector<8x8xf32>
    %55 = vector.extract_strided_slice %28 {offsets = [0, 40], sizes = [8, 8], strides = [1, 1]} : vector<8x96xf32> to vector<8x8xf32>
    %56 = vector.extract_strided_slice %28 {offsets = [0, 72], sizes = [8, 8], strides = [1, 1]} : vector<8x96xf32> to vector<8x8xf32>
    %cst_25 = arith.constant dense<0.000000e+00> : vector<8x8xf32>
    %57 = tpu.matmul %54, %55, %cst_25 {dimension_numbers = #tpu.dot_dimension_numbers<[1], [1], [0], [0], [0, 0, 1, 0], [], []>} : vector<8x8xf32>, vector<8x8xf32>, vector<8x8xf32> -> vector<8x8xf32>
    %cst_26 = arith.constant 2.82842708 : f32
    %58 = vector.broadcast %cst_26 : f32 to vector<8x8xf32>
    %59 = arith.divf %57, %58 : vector<8x8xf32>
    %cst_27 = arith.constant 0.000000e+00 : f32
    %60 = vector.broadcast %cst_27 : f32 to vector<1x8xf32>
    %61 = arith.cmpf ogt, %30, %60 : vector<1x8xf32>
    %cst_28 = arith.constant -1.000000e+30 : f32
    %62 = vector.shape_cast %61 : vector<1x8xi1> to vector<1x8xi1>
    %63 = vector.broadcast %62 : vector<1x8xi1> to vector<8x8xi1>
    %64 = vector.broadcast %cst_28 : f32 to vector<8x8xf32>
    %65 = arith.select %63, %59, %64 : vector<8x8xi1>, vector<8x8xf32>
    %cst_29 = arith.constant dense<0xFF800000> : vector<8xf32>
    %66 = vector.multi_reduction <maximumf>, %65, %cst_29 [1] : vector<8x8xf32> to vector<8xf32>
    %67 = vector.shape_cast %66 : vector<8xf32> to vector<8x1xf32>
    %68 = vector.broadcast %67 : vector<8x1xf32> to vector<8x8xf32>
    %69 = arith.subf %65, %68 : vector<8x8xf32>
    %70 = math.exp %69 : vector<8x8xf32>
    %cst_30 = arith.constant dense<0.000000e+00> : vector<8xf32>
    %71 = vector.multi_reduction <add>, %70, %cst_30 [1] : vector<8x8xf32> to vector<8xf32>
    %72 = vector.shape_cast %71 : vector<8xf32> to vector<8x1xf32>
    %73 = tpu.reciprocal %72 {approx = true} : vector<8x1xf32> -> vector<8x1xf32>
    %74 = vector.broadcast %73 : vector<8x1xf32> to vector<8x8xf32>
    %75 = arith.mulf %70, %74 : vector<8x8xf32>
    %cst_31 = arith.constant dense<0.000000e+00> : vector<8x8xf32>
    %76 = tpu.matmul %75, %56, %cst_31 {dimension_numbers = #tpu.dot_dimension_numbers<[1], [0], [0], [1], [0, 0, 1, 1], [], []>} : vector<8x8xf32>, vector<8x8xf32>, vector<8x8xf32> -> vector<8x8xf32>
    %77 = vector.extract_strided_slice %28 {offsets = [0, 16], sizes = [8, 8], strides = [1, 1]} : vector<8x96xf32> to vector<8x8xf32>
    %78 = vector.extract_strided_slice %28 {offsets = [0, 48], sizes = [8, 8], strides = [1, 1]} : vector<8x96xf32> to vector<8x8xf32>
    %79 = vector.extract_strided_slice %28 {offsets = [0, 80], sizes = [8, 8], strides = [1, 1]} : vector<8x96xf32> to vector<8x8xf32>
    %cst_32 = arith.constant dense<0.000000e+00> : vector<8x8xf32>
    %80 = tpu.matmul %77, %78, %cst_32 {dimension_numbers = #tpu.dot_dimension_numbers<[1], [1], [0], [0], [0, 0, 1, 0], [], []>} : vector<8x8xf32>, vector<8x8xf32>, vector<8x8xf32> -> vector<8x8xf32>
    %cst_33 = arith.constant 2.82842708 : f32
    %81 = vector.broadcast %cst_33 : f32 to vector<8x8xf32>
    %82 = arith.divf %80, %81 : vector<8x8xf32>
    %cst_34 = arith.constant 0.000000e+00 : f32
    %83 = vector.broadcast %cst_34 : f32 to vector<1x8xf32>
    %84 = arith.cmpf ogt, %30, %83 : vector<1x8xf32>
    %cst_35 = arith.constant -1.000000e+30 : f32
    %85 = vector.shape_cast %84 : vector<1x8xi1> to vector<1x8xi1>
    %86 = vector.broadcast %85 : vector<1x8xi1> to vector<8x8xi1>
    %87 = vector.broadcast %cst_35 : f32 to vector<8x8xf32>
    %88 = arith.select %86, %82, %87 : vector<8x8xi1>, vector<8x8xf32>
    %cst_36 = arith.constant dense<0xFF800000> : vector<8xf32>
    %89 = vector.multi_reduction <maximumf>, %88, %cst_36 [1] : vector<8x8xf32> to vector<8xf32>
    %90 = vector.shape_cast %89 : vector<8xf32> to vector<8x1xf32>
    %91 = vector.broadcast %90 : vector<8x1xf32> to vector<8x8xf32>
    %92 = arith.subf %88, %91 : vector<8x8xf32>
    %93 = math.exp %92 : vector<8x8xf32>
    %cst_37 = arith.constant dense<0.000000e+00> : vector<8xf32>
    %94 = vector.multi_reduction <add>, %93, %cst_37 [1] : vector<8x8xf32> to vector<8xf32>
    %95 = vector.shape_cast %94 : vector<8xf32> to vector<8x1xf32>
    %96 = tpu.reciprocal %95 {approx = true} : vector<8x1xf32> -> vector<8x1xf32>
    %97 = vector.broadcast %96 : vector<8x1xf32> to vector<8x8xf32>
    %98 = arith.mulf %93, %97 : vector<8x8xf32>
    %cst_38 = arith.constant dense<0.000000e+00> : vector<8x8xf32>
    %99 = tpu.matmul %98, %79, %cst_38 {dimension_numbers = #tpu.dot_dimension_numbers<[1], [0], [0], [1], [0, 0, 1, 1], [], []>} : vector<8x8xf32>, vector<8x8xf32>, vector<8x8xf32> -> vector<8x8xf32>
    %100 = vector.extract_strided_slice %28 {offsets = [0, 24], sizes = [8, 8], strides = [1, 1]} : vector<8x96xf32> to vector<8x8xf32>
    %101 = vector.extract_strided_slice %28 {offsets = [0, 56], sizes = [8, 8], strides = [1, 1]} : vector<8x96xf32> to vector<8x8xf32>
    %102 = vector.extract_strided_slice %28 {offsets = [0, 88], sizes = [8, 8], strides = [1, 1]} : vector<8x96xf32> to vector<8x8xf32>
    %cst_39 = arith.constant dense<0.000000e+00> : vector<8x8xf32>
    %103 = tpu.matmul %100, %101, %cst_39 {dimension_numbers = #tpu.dot_dimension_numbers<[1], [1], [0], [0], [0, 0, 1, 0], [], []>} : vector<8x8xf32>, vector<8x8xf32>, vector<8x8xf32> -> vector<8x8xf32>
    %cst_40 = arith.constant 2.82842708 : f32
    %104 = vector.broadcast %cst_40 : f32 to vector<8x8xf32>
    %105 = arith.divf %103, %104 : vector<8x8xf32>
    %cst_41 = arith.constant 0.000000e+00 : f32
    %106 = vector.broadcast %cst_41 : f32 to vector<1x8xf32>
    %107 = arith.cmpf ogt, %30, %106 : vector<1x8xf32>
    %cst_42 = arith.constant -1.000000e+30 : f32
    %108 = vector.shape_cast %107 : vector<1x8xi1> to vector<1x8xi1>
    %109 = vector.broadcast %108 : vector<1x8xi1> to vector<8x8xi1>
    %110 = vector.broadcast %cst_42 : f32 to vector<8x8xf32>
    %111 = arith.select %109, %105, %110 : vector<8x8xi1>, vector<8x8xf32>
    %cst_43 = arith.constant dense<0xFF800000> : vector<8xf32>
    %112 = vector.multi_reduction <maximumf>, %111, %cst_43 [1] : vector<8x8xf32> to vector<8xf32>
    %113 = vector.shape_cast %112 : vector<8xf32> to vector<8x1xf32>
    %114 = vector.broadcast %113 : vector<8x1xf32> to vector<8x8xf32>
    %115 = arith.subf %111, %114 : vector<8x8xf32>
    %116 = math.exp %115 : vector<8x8xf32>
    %cst_44 = arith.constant dense<0.000000e+00> : vector<8xf32>
    %117 = vector.multi_reduction <add>, %116, %cst_44 [1] : vector<8x8xf32> to vector<8xf32>
    %118 = vector.shape_cast %117 : vector<8xf32> to vector<8x1xf32>
    %119 = tpu.reciprocal %118 {approx = true} : vector<8x1xf32> -> vector<8x1xf32>
    %120 = vector.broadcast %119 : vector<8x1xf32> to vector<8x8xf32>
    %121 = arith.mulf %116, %120 : vector<8x8xf32>
    %cst_45 = arith.constant dense<0.000000e+00> : vector<8x8xf32>
    %122 = tpu.matmul %121, %102, %cst_45 {dimension_numbers = #tpu.dot_dimension_numbers<[1], [0], [0], [1], [0, 0, 1, 1], [], []>} : vector<8x8xf32>, vector<8x8xf32>, vector<8x8xf32> -> vector<8x8xf32>
    %123 = tpu.concatenate %53, %76, %99, %122 in 1 : vector<8x8xf32>, vector<8x8xf32>, vector<8x8xf32>, vector<8x8xf32> -> vector<8x32xf32>
    %c0_46 = arith.constant 0 : index
    %c0_47 = arith.constant 0 : index
    %124 = vector.load %arg7[%c0_46, %c0_47] : memref<32x32xf32, #tpu.memory_space<vmem>>, vector<32x32xf32>
    %cst_48 = arith.constant dense<0.000000e+00> : vector<8x32xf32>
    %125 = tpu.matmul %123, %124, %cst_48 {dimension_numbers = #tpu.dot_dimension_numbers<[1], [0], [0], [1], [0, 0, 1, 1], [], []>} : vector<8x32xf32>, vector<32x32xf32>, vector<8x32xf32> -> vector<8x32xf32>
    %c0_49 = arith.constant 0 : index
    %c0_50 = arith.constant 0 : index
    %126 = vector.load %arg8[%c0_49, %c0_50] : memref<1x32xf32, #tpu.memory_space<vmem>>, vector<1x32xf32>
    %127 = vector.broadcast %126 : vector<1x32xf32> to vector<8x32xf32>
    %128 = arith.addf %125, %127 : vector<8x32xf32>
    %129 = arith.addf %1, %128 : vector<8x32xf32>
    %c0_51 = arith.constant 0 : index
    %c0_52 = arith.constant 0 : index
    %130 = vector.load %arg9[%c0_51, %c0_52] : memref<1x32xf32, #tpu.memory_space<vmem>>, vector<1x32xf32>
    %c0_53 = arith.constant 0 : index
    %c0_54 = arith.constant 0 : index
    %131 = vector.load %arg10[%c0_53, %c0_54] : memref<1x32xf32, #tpu.memory_space<vmem>>, vector<1x32xf32>
    %cst_55 = arith.constant dense<0.000000e+00> : vector<8xf32>
    %132 = vector.multi_reduction <add>, %129, %cst_55 [1] : vector<8x32xf32> to vector<8xf32>
    %133 = vector.shape_cast %132 : vector<8xf32> to vector<8x1xf32>
    %cst_56 = arith.constant 3.200000e+01 : f32
    %134 = vector.broadcast %cst_56 : f32 to vector<8x1xf32>
    %135 = arith.divf %133, %134 : vector<8x1xf32>
    %136 = vector.broadcast %135 : vector<8x1xf32> to vector<8x32xf32>
    %137 = arith.subf %129, %136 : vector<8x32xf32>
    %138 = arith.mulf %137, %137 : vector<8x32xf32>
    %cst_57 = arith.constant dense<0.000000e+00> : vector<8xf32>
    %139 = vector.multi_reduction <add>, %138, %cst_57 [1] : vector<8x32xf32> to vector<8xf32>
    %140 = vector.shape_cast %139 : vector<8xf32> to vector<8x1xf32>
    %cst_58 = arith.constant 3.200000e+01 : f32
    %141 = vector.broadcast %cst_58 : f32 to vector<8x1xf32>
    %142 = arith.divf %140, %141 : vector<8x1xf32>
    %cst_59 = arith.constant 9.99999974E-6 : f32
    %143 = vector.broadcast %cst_59 : f32 to vector<8x1xf32>
    %144 = arith.addf %142, %143 : vector<8x1xf32>
    %145 = math.rsqrt %144 : vector<8x1xf32>
    %146 = vector.broadcast %145 : vector<8x1xf32> to vector<8x32xf32>
    %147 = arith.mulf %137, %146 : vector<8x32xf32>
    %148 = vector.broadcast %130 : vector<1x32xf32> to vector<8x32xf32>
    %149 = arith.mulf %147, %148 : vector<8x32xf32>
    %150 = vector.broadcast %131 : vector<1x32xf32> to vector<8x32xf32>
    %151 = arith.addf %149, %150 : vector<8x32xf32>
    %c0_60 = arith.constant 0 : index
    %c0_61 = arith.constant 0 : index
    %152 = vector.load %arg11[%c0_60, %c0_61] : memref<32x32xf32, #tpu.memory_space<vmem>>, vector<32x32xf32>
    %cst_62 = arith.constant dense<0.000000e+00> : vector<8x32xf32>
    %153 = tpu.matmul %151, %152, %cst_62 {dimension_numbers = #tpu.dot_dimension_numbers<[1], [0], [0], [1], [0, 0, 1, 1], [], []>} : vector<8x32xf32>, vector<32x32xf32>, vector<8x32xf32> -> vector<8x32xf32>
    %c0_63 = arith.constant 0 : index
    %c0_64 = arith.constant 0 : index
    %154 = vector.load %arg12[%c0_63, %c0_64] : memref<1x32xf32, #tpu.memory_space<vmem>>, vector<1x32xf32>
    %155 = vector.broadcast %154 : vector<1x32xf32> to vector<8x32xf32>
    %156 = arith.addf %153, %155 : vector<8x32xf32>
    %cst_65 = arith.constant 0.000000e+00 : f32
    %157 = vector.broadcast %cst_65 : f32 to vector<8x32xf32>
    %158 = arith.maximumf %156, %157 : vector<8x32xf32>
    %159 = arith.addf %129, %158 : vector<8x32xf32>
    %c0_66 = arith.constant 0 : index
    %c0_67 = arith.constant 0 : index
    %c0_68 = arith.constant 0 : index
    %160 = vector.load %arg13[%c0_66, %c0_67, %c0_68] : memref<1x8x32xf32, #tpu.memory_space<vmem>>, vector<1x8x32xf32>
    %161 = vector.shape_cast %160 : vector<1x8x32xf32> to vector<8x32xf32>
    %162 = vector.shape_cast %159 : vector<8x32xf32> to vector<1x8x32xf32>
    tpu.vector_store %arg13[%c0_66, %c0_67, %c0_68], %162 {strides = array<i32>} : memref<1x8x32xf32, #tpu.memory_space<vmem>>, vector<1x8x32xf32>,
    return
  }
  func.func @transform_0(%arg0: i32) -> (i32, i32, i32) {
    %c0_i32 = arith.constant 0 : i32
    %c0_i32_0 = arith.constant 0 : i32
    %c0_i32_1 = arith.constant 0 : i32
    return %arg0, %c0_i32, %c0_i32_0 : i32, i32, i32
  }
  func.func @transform_1(%arg0: i32) -> (i32, i32, i32) {
    %c0_i32 = arith.constant 0 : i32
    %c0_i32_0 = arith.constant 0 : i32
    %c0_i32_1 = arith.constant 0 : i32
    return %arg0, %c0_i32, %c0_i32_0 : i32, i32, i32
  }
  func.func @transform_2(%arg0: i32) -> (i32, i32) {
    %c0_i32 = arith.constant 0 : i32
    %c0_i32_0 = arith.constant 0 : i32
    %c0_i32_1 = arith.constant 0 : i32
    return %c0_i32, %c0_i32_0 : i32, i32
  }
  func.func @transform_3(%arg0: i32) -> (i32, i32) {
    %c0_i32 = arith.constant 0 : i32
    %c0_i32_0 = arith.constant 0 : i32
    %c0_i32_1 = arith.constant 0 : i32
    return %c0_i32, %c0_i32_0 : i32, i32
  }
  func.func @transform_4(%arg0: i32) -> (i32, i32) {
    %c0_i32 = arith.constant 0 : i32
    %c0_i32_0 = arith.constant 0 : i32
    %c0_i32_1 = arith.constant 0 : i32
    return %c0_i32, %c0_i32_0 : i32, i32
  }
  func.func @transform_5(%arg0: i32) -> (i32, i32) {
    %c0_i32 = arith.constant 0 : i32
    %c0_i32_0 = arith.constant 0 : i32
    %c0_i32_1 = arith.constant 0 : i32
    return %c0_i32, %c0_i32_0 : i32, i32
  }
  func.func @transform_6(%arg0: i32) -> (i32, i32) {
    %c0_i32 = arith.constant 0 : i32
    %c0_i32_0 = arith.constant 0 : i32
    %c0_i32_1 = arith.constant 0 : i32
    return %c0_i32, %c0_i32_0 : i32, i32
  }
  func.func @transform_7(%arg0: i32) -> (i32, i32) {
    %c0_i32 = arith.constant 0 : i32
    %c0_i32_0 = arith.constant 0 : i32
    %c0_i32_1 = arith.constant 0 : i32
    return %c0_i32, %c0_i32_0 : i32, i32
  }
  func.func @transform_8(%arg0: i32) -> (i32, i32) {
    %c0_i32 = arith.constant 0 : i32
    %c0_i32_0 = arith.constant 0 : i32
    %c0_i32_1 = arith.constant 0 : i32
    return %c0_i32, %c0_i32_0 : i32, i32
  }
  func.func @transform_9(%arg0: i32) -> (i32, i32) {
    %c0_i32 = arith.constant 0 : i32
    %c0_i32_0 = arith.constant 0 : i32
    %c0_i32_1 = arith.constant 0 : i32
    return %c0_i32, %c0_i32_0 : i32, i32
  }
  func.func @transform_10(%arg0: i32) -> (i32, i32) {
    %c0_i32 = arith.constant 0 : i32
    %c0_i32_0 = arith.constant 0 : i32
    %c0_i32_1 = arith.constant 0 : i32
    return %c0_i32, %c0_i32_0 : i32, i32
  }
  func.func @transform_11(%arg0: i32) -> (i32, i32) {
    %c0_i32 = arith.constant 0 : i32
    %c0_i32_0 = arith.constant 0 : i32
    %c0_i32_1 = arith.constant 0 : i32
    return %c0_i32, %c0_i32_0 : i32, i32
  }
  func.func @transform_12(%arg0: i32) -> (i32, i32, i32) {
    %c0_i32 = arith.constant 0 : i32
    %c0_i32_0 = arith.constant 0 : i32
    %c0_i32_1 = arith.constant 0 : i32
    return %arg0, %c0_i32, %c0_i32_0 : i32, i32, i32
  }
}

module attributes {stable_mosaic.version = 11 : i64} {
  func.func @_pe_convs_kernel(%arg0: i32, %arg1: memref<1x8x32xf32, #tpu.memory_space<vmem>>, %arg2: memref<8x32xf32, #tpu.memory_space<vmem>>, %arg3: memref<1x32xf32, #tpu.memory_space<vmem>>, %arg4: memref<1x32xf32, #tpu.memory_space<vmem>>, %arg5: memref<5x1x32xf32, #tpu.memory_space<vmem>>, %arg6: memref<1x32xf32, #tpu.memory_space<vmem>>, %arg7: memref<32x32xf32, #tpu.memory_space<vmem>>, %arg8: memref<1x32xf32, #tpu.memory_space<vmem>>, %arg9: memref<1x32xf32, #tpu.memory_space<vmem>>, %arg10: memref<1x32xf32, #tpu.memory_space<vmem>>, %arg11: memref<5x1x32xf32, #tpu.memory_space<vmem>>, %arg12: memref<1x32xf32, #tpu.memory_space<vmem>>, %arg13: memref<32x32xf32, #tpu.memory_space<vmem>>, %arg14: memref<1x32xf32, #tpu.memory_space<vmem>>, %arg15: memref<1x8x32xf32, #tpu.memory_space<vmem>>) attributes {dimension_semantics = [#tpu.dimension_semantics<parallel>], iteration_bounds = array<i64: 2>, scalar_prefetch = 0 : i64, scratch_operands = 0 : i64, tpu.core_type = #tpu.core_type<tc>, window_params = [{transform_indices = @transform_0, window_bounds = array<i64: 1, 8, 32>}, {pipeline_mode = #tpu.pipeline_mode<synchronous>, transform_indices = @transform_1, window_bounds = array<i64: 8, 32>}, {pipeline_mode = #tpu.pipeline_mode<synchronous>, transform_indices = @transform_2, window_bounds = array<i64: 1, 32>}, {pipeline_mode = #tpu.pipeline_mode<synchronous>, transform_indices = @transform_3, window_bounds = array<i64: 1, 32>}, {pipeline_mode = #tpu.pipeline_mode<synchronous>, transform_indices = @transform_4, window_bounds = array<i64: 5, 1, 32>}, {pipeline_mode = #tpu.pipeline_mode<synchronous>, transform_indices = @transform_5, window_bounds = array<i64: 1, 32>}, {pipeline_mode = #tpu.pipeline_mode<synchronous>, transform_indices = @transform_6, window_bounds = array<i64: 32, 32>}, {pipeline_mode = #tpu.pipeline_mode<synchronous>, transform_indices = @transform_7, window_bounds = array<i64: 1, 32>}, {pipeline_mode = #tpu.pipeline_mode<synchronous>, transform_indices = @transform_8, window_bounds = array<i64: 1, 32>}, {pipeline_mode = #tpu.pipeline_mode<synchronous>, transform_indices = @transform_9, window_bounds = array<i64: 1, 32>}, {pipeline_mode = #tpu.pipeline_mode<synchronous>, transform_indices = @transform_10, window_bounds = array<i64: 5, 1, 32>}, {pipeline_mode = #tpu.pipeline_mode<synchronous>, transform_indices = @transform_11, window_bounds = array<i64: 1, 32>}, {pipeline_mode = #tpu.pipeline_mode<synchronous>, transform_indices = @transform_12, window_bounds = array<i64: 32, 32>}, {pipeline_mode = #tpu.pipeline_mode<synchronous>, transform_indices = @transform_13, window_bounds = array<i64: 1, 32>}, {transform_indices = @transform_14, window_bounds = array<i64: 1, 8, 32>}]} {
    %c0 = arith.constant 0 : index
    %c0_0 = arith.constant 0 : index
    %c0_1 = arith.constant 0 : index
    %0 = vector.load %arg1[%c0, %c0_0, %c0_1] : memref<1x8x32xf32, #tpu.memory_space<vmem>>, vector<1x8x32xf32>
    %1 = vector.shape_cast %0 : vector<1x8x32xf32> to vector<8x32xf32>
    %c0_2 = arith.constant 0 : index
    %c0_3 = arith.constant 0 : index
    %2 = vector.load %arg2[%c0_2, %c0_3] : memref<8x32xf32, #tpu.memory_space<vmem>>, vector<8x32xf32>
    %3 = arith.addf %1, %2 : vector<8x32xf32>
    %4 = tpu.iota {dimensions = array<i32: 0>} : vector<8x1xi32>
    %c0_4 = arith.constant 0 : index
    %c0_5 = arith.constant 0 : index
    %5 = vector.load %arg3[%c0_4, %c0_5] : memref<1x32xf32, #tpu.memory_space<vmem>>, vector<1x32xf32>
    %c0_6 = arith.constant 0 : index
    %c0_7 = arith.constant 0 : index
    %6 = vector.load %arg4[%c0_6, %c0_7] : memref<1x32xf32, #tpu.memory_space<vmem>>, vector<1x32xf32>
    %cst = arith.constant dense<0.000000e+00> : vector<8xf32>
    %7 = vector.multi_reduction <add>, %3, %cst [1] : vector<8x32xf32> to vector<8xf32>
    %8 = vector.shape_cast %7 : vector<8xf32> to vector<8x1xf32>
    %cst_8 = arith.constant 3.200000e+01 : f32
    %9 = vector.broadcast %cst_8 : f32 to vector<8x1xf32>
    %10 = arith.divf %8, %9 : vector<8x1xf32>
    %11 = vector.broadcast %10 : vector<8x1xf32> to vector<8x32xf32>
    %12 = arith.subf %3, %11 : vector<8x32xf32>
    %13 = arith.mulf %12, %12 : vector<8x32xf32>
    %cst_9 = arith.constant dense<0.000000e+00> : vector<8xf32>
    %14 = vector.multi_reduction <add>, %13, %cst_9 [1] : vector<8x32xf32> to vector<8xf32>
    %15 = vector.shape_cast %14 : vector<8xf32> to vector<8x1xf32>
    %cst_10 = arith.constant 3.200000e+01 : f32
    %16 = vector.broadcast %cst_10 : f32 to vector<8x1xf32>
    %17 = arith.divf %15, %16 : vector<8x1xf32>
    %cst_11 = arith.constant 9.99999974E-6 : f32
    %18 = vector.broadcast %cst_11 : f32 to vector<8x1xf32>
    %19 = arith.addf %17, %18 : vector<8x1xf32>
    %20 = math.rsqrt %19 : vector<8x1xf32>
    %21 = vector.broadcast %20 : vector<8x1xf32> to vector<8x32xf32>
    %22 = arith.mulf %12, %21 : vector<8x32xf32>
    %23 = vector.broadcast %5 : vector<1x32xf32> to vector<8x32xf32>
    %24 = arith.mulf %22, %23 : vector<8x32xf32>
    %25 = vector.broadcast %6 : vector<1x32xf32> to vector<8x32xf32>
    %26 = arith.addf %24, %25 : vector<8x32xf32>
    %cst_12 = arith.constant 0.000000e+00 : f32
    %27 = vector.broadcast %cst_12 : f32 to vector<8x32xf32>
    %c2_i32 = arith.constant 2 : i32
    %28 = tpu.dynamic_rotate %26 by %c2_i32 dim 0 : vector<8x32xf32>, i32 -> vector<8x32xf32>
    %c-2_i32 = arith.constant -2 : i32
    %29 = vector.broadcast %c-2_i32 : i32 to vector<8x1xi32>
    %30 = arith.addi %4, %29 : vector<8x1xi32>
    %c0_i32 = arith.constant 0 : i32
    %31 = vector.broadcast %c0_i32 : i32 to vector<8x1xi32>
    %32 = arith.cmpi sge, %30, %31 : vector<8x1xi32>
    %c-2_i32_13 = arith.constant -2 : i32
    %33 = vector.broadcast %c-2_i32_13 : i32 to vector<8x1xi32>
    %34 = arith.addi %4, %33 : vector<8x1xi32>
    %c8_i32 = arith.constant 8 : i32
    %35 = vector.broadcast %c8_i32 : i32 to vector<8x1xi32>
    %36 = arith.cmpi slt, %34, %35 : vector<8x1xi32>
    %37 = arith.andi %32, %36 : vector<8x1xi1>
    %cst_14 = arith.constant 0.000000e+00 : f32
    %38 = vector.shape_cast %37 : vector<8x1xi1> to vector<8x1xi1>
    %39 = vector.broadcast %38 : vector<8x1xi1> to vector<8x32xi1>
    %40 = vector.broadcast %cst_14 : f32 to vector<8x32xf32>
    %41 = arith.select %39, %28, %40 : vector<8x32xi1>, vector<8x32xf32>
    %c0_15 = arith.constant 0 : index
    %c0_16 = arith.constant 0 : index
    %c0_17 = arith.constant 0 : index
    %42 = vector.load %arg5[%c0_15, %c0_16, %c0_17] : memref<5x1x32xf32, #tpu.memory_space<vmem>>, vector<1x1x32xf32>
    %43 = vector.shape_cast %42 : vector<1x1x32xf32> to vector<1x32xf32>
    %44 = vector.broadcast %43 : vector<1x32xf32> to vector<8x32xf32>
    %45 = arith.mulf %41, %44 : vector<8x32xf32>
    %46 = arith.addf %27, %45 : vector<8x32xf32>
    %c1_i32 = arith.constant 1 : i32
    %47 = tpu.dynamic_rotate %26 by %c1_i32 dim 0 : vector<8x32xf32>, i32 -> vector<8x32xf32>
    %c-1_i32 = arith.constant -1 : i32
    %48 = vector.broadcast %c-1_i32 : i32 to vector<8x1xi32>
    %49 = arith.addi %4, %48 : vector<8x1xi32>
    %c0_i32_18 = arith.constant 0 : i32
    %50 = vector.broadcast %c0_i32_18 : i32 to vector<8x1xi32>
    %51 = arith.cmpi sge, %49, %50 : vector<8x1xi32>
    %c-1_i32_19 = arith.constant -1 : i32
    %52 = vector.broadcast %c-1_i32_19 : i32 to vector<8x1xi32>
    %53 = arith.addi %4, %52 : vector<8x1xi32>
    %c8_i32_20 = arith.constant 8 : i32
    %54 = vector.broadcast %c8_i32_20 : i32 to vector<8x1xi32>
    %55 = arith.cmpi slt, %53, %54 : vector<8x1xi32>
    %56 = arith.andi %51, %55 : vector<8x1xi1>
    %cst_21 = arith.constant 0.000000e+00 : f32
    %57 = vector.shape_cast %56 : vector<8x1xi1> to vector<8x1xi1>
    %58 = vector.broadcast %57 : vector<8x1xi1> to vector<8x32xi1>
    %59 = vector.broadcast %cst_21 : f32 to vector<8x32xf32>
    %60 = arith.select %58, %47, %59 : vector<8x32xi1>, vector<8x32xf32>
    %c1 = arith.constant 1 : index
    %c0_22 = arith.constant 0 : index
    %c0_23 = arith.constant 0 : index
    %61 = vector.load %arg5[%c1, %c0_22, %c0_23] : memref<5x1x32xf32, #tpu.memory_space<vmem>>, vector<1x1x32xf32>
    %62 = vector.shape_cast %61 : vector<1x1x32xf32> to vector<1x32xf32>
    %63 = vector.broadcast %62 : vector<1x32xf32> to vector<8x32xf32>
    %64 = arith.mulf %60, %63 : vector<8x32xf32>
    %65 = arith.addf %46, %64 : vector<8x32xf32>
    %c2 = arith.constant 2 : index
    %c0_24 = arith.constant 0 : index
    %c0_25 = arith.constant 0 : index
    %66 = vector.load %arg5[%c2, %c0_24, %c0_25] : memref<5x1x32xf32, #tpu.memory_space<vmem>>, vector<1x1x32xf32>
    %67 = vector.shape_cast %66 : vector<1x1x32xf32> to vector<1x32xf32>
    %68 = vector.broadcast %67 : vector<1x32xf32> to vector<8x32xf32>
    %69 = arith.mulf %26, %68 : vector<8x32xf32>
    %70 = arith.addf %65, %69 : vector<8x32xf32>
    %c7_i32 = arith.constant 7 : i32
    %71 = tpu.dynamic_rotate %26 by %c7_i32 dim 0 : vector<8x32xf32>, i32 -> vector<8x32xf32>
    %c1_i32_26 = arith.constant 1 : i32
    %72 = vector.broadcast %c1_i32_26 : i32 to vector<8x1xi32>
    %73 = arith.addi %4, %72 : vector<8x1xi32>
    %c0_i32_27 = arith.constant 0 : i32
    %74 = vector.broadcast %c0_i32_27 : i32 to vector<8x1xi32>
    %75 = arith.cmpi sge, %73, %74 : vector<8x1xi32>
    %c1_i32_28 = arith.constant 1 : i32
    %76 = vector.broadcast %c1_i32_28 : i32 to vector<8x1xi32>
    %77 = arith.addi %4, %76 : vector<8x1xi32>
    %c8_i32_29 = arith.constant 8 : i32
    %78 = vector.broadcast %c8_i32_29 : i32 to vector<8x1xi32>
    %79 = arith.cmpi slt, %77, %78 : vector<8x1xi32>
    %80 = arith.andi %75, %79 : vector<8x1xi1>
    %cst_30 = arith.constant 0.000000e+00 : f32
    %81 = vector.shape_cast %80 : vector<8x1xi1> to vector<8x1xi1>
    %82 = vector.broadcast %81 : vector<8x1xi1> to vector<8x32xi1>
    %83 = vector.broadcast %cst_30 : f32 to vector<8x32xf32>
    %84 = arith.select %82, %71, %83 : vector<8x32xi1>, vector<8x32xf32>
    %c3 = arith.constant 3 : index
    %c0_31 = arith.constant 0 : index
    %c0_32 = arith.constant 0 : index
    %85 = vector.load %arg5[%c3, %c0_31, %c0_32] : memref<5x1x32xf32, #tpu.memory_space<vmem>>, vector<1x1x32xf32>
    %86 = vector.shape_cast %85 : vector<1x1x32xf32> to vector<1x32xf32>
    %87 = vector.broadcast %86 : vector<1x32xf32> to vector<8x32xf32>
    %88 = arith.mulf %84, %87 : vector<8x32xf32>
    %89 = arith.addf %70, %88 : vector<8x32xf32>
    %c6_i32 = arith.constant 6 : i32
    %90 = tpu.dynamic_rotate %26 by %c6_i32 dim 0 : vector<8x32xf32>, i32 -> vector<8x32xf32>
    %c2_i32_33 = arith.constant 2 : i32
    %91 = vector.broadcast %c2_i32_33 : i32 to vector<8x1xi32>
    %92 = arith.addi %4, %91 : vector<8x1xi32>
    %c0_i32_34 = arith.constant 0 : i32
    %93 = vector.broadcast %c0_i32_34 : i32 to vector<8x1xi32>
    %94 = arith.cmpi sge, %92, %93 : vector<8x1xi32>
    %c2_i32_35 = arith.constant 2 : i32
    %95 = vector.broadcast %c2_i32_35 : i32 to vector<8x1xi32>
    %96 = arith.addi %4, %95 : vector<8x1xi32>
    %c8_i32_36 = arith.constant 8 : i32
    %97 = vector.broadcast %c8_i32_36 : i32 to vector<8x1xi32>
    %98 = arith.cmpi slt, %96, %97 : vector<8x1xi32>
    %99 = arith.andi %94, %98 : vector<8x1xi1>
    %cst_37 = arith.constant 0.000000e+00 : f32
    %100 = vector.shape_cast %99 : vector<8x1xi1> to vector<8x1xi1>
    %101 = vector.broadcast %100 : vector<8x1xi1> to vector<8x32xi1>
    %102 = vector.broadcast %cst_37 : f32 to vector<8x32xf32>
    %103 = arith.select %101, %90, %102 : vector<8x32xi1>, vector<8x32xf32>
    %c4 = arith.constant 4 : index
    %c0_38 = arith.constant 0 : index
    %c0_39 = arith.constant 0 : index
    %104 = vector.load %arg5[%c4, %c0_38, %c0_39] : memref<5x1x32xf32, #tpu.memory_space<vmem>>, vector<1x1x32xf32>
    %105 = vector.shape_cast %104 : vector<1x1x32xf32> to vector<1x32xf32>
    %106 = vector.broadcast %105 : vector<1x32xf32> to vector<8x32xf32>
    %107 = arith.mulf %103, %106 : vector<8x32xf32>
    %108 = arith.addf %89, %107 : vector<8x32xf32>
    %c0_40 = arith.constant 0 : index
    %c0_41 = arith.constant 0 : index
    %109 = vector.load %arg6[%c0_40, %c0_41] : memref<1x32xf32, #tpu.memory_space<vmem>>, vector<1x32xf32>
    %110 = vector.broadcast %109 : vector<1x32xf32> to vector<8x32xf32>
    %111 = arith.addf %108, %110 : vector<8x32xf32>
    %c0_42 = arith.constant 0 : index
    %c0_43 = arith.constant 0 : index
    %112 = vector.load %arg7[%c0_42, %c0_43] : memref<32x32xf32, #tpu.memory_space<vmem>>, vector<32x32xf32>
    %cst_44 = arith.constant dense<0.000000e+00> : vector<8x32xf32>
    %113 = tpu.matmul %111, %112, %cst_44 {dimension_numbers = #tpu.dot_dimension_numbers<[1], [0], [0], [1], [0, 0, 1, 1], [], []>} : vector<8x32xf32>, vector<32x32xf32>, vector<8x32xf32> -> vector<8x32xf32>
    %c0_45 = arith.constant 0 : index
    %c0_46 = arith.constant 0 : index
    %114 = vector.load %arg8[%c0_45, %c0_46] : memref<1x32xf32, #tpu.memory_space<vmem>>, vector<1x32xf32>
    %115 = vector.broadcast %114 : vector<1x32xf32> to vector<8x32xf32>
    %116 = arith.addf %113, %115 : vector<8x32xf32>
    %cst_47 = arith.constant 0.000000e+00 : f32
    %117 = vector.broadcast %cst_47 : f32 to vector<8x32xf32>
    %118 = arith.maximumf %116, %117 : vector<8x32xf32>
    %119 = arith.addf %3, %118 : vector<8x32xf32>
    %c0_48 = arith.constant 0 : index
    %c0_49 = arith.constant 0 : index
    %120 = vector.load %arg9[%c0_48, %c0_49] : memref<1x32xf32, #tpu.memory_space<vmem>>, vector<1x32xf32>
    %c0_50 = arith.constant 0 : index
    %c0_51 = arith.constant 0 : index
    %121 = vector.load %arg10[%c0_50, %c0_51] : memref<1x32xf32, #tpu.memory_space<vmem>>, vector<1x32xf32>
    %cst_52 = arith.constant dense<0.000000e+00> : vector<8xf32>
    %122 = vector.multi_reduction <add>, %119, %cst_52 [1] : vector<8x32xf32> to vector<8xf32>
    %123 = vector.shape_cast %122 : vector<8xf32> to vector<8x1xf32>
    %cst_53 = arith.constant 3.200000e+01 : f32
    %124 = vector.broadcast %cst_53 : f32 to vector<8x1xf32>
    %125 = arith.divf %123, %124 : vector<8x1xf32>
    %126 = vector.broadcast %125 : vector<8x1xf32> to vector<8x32xf32>
    %127 = arith.subf %119, %126 : vector<8x32xf32>
    %128 = arith.mulf %127, %127 : vector<8x32xf32>
    %cst_54 = arith.constant dense<0.000000e+00> : vector<8xf32>
    %129 = vector.multi_reduction <add>, %128, %cst_54 [1] : vector<8x32xf32> to vector<8xf32>
    %130 = vector.shape_cast %129 : vector<8xf32> to vector<8x1xf32>
    %cst_55 = arith.constant 3.200000e+01 : f32
    %131 = vector.broadcast %cst_55 : f32 to vector<8x1xf32>
    %132 = arith.divf %130, %131 : vector<8x1xf32>
    %cst_56 = arith.constant 9.99999974E-6 : f32
    %133 = vector.broadcast %cst_56 : f32 to vector<8x1xf32>
    %134 = arith.addf %132, %133 : vector<8x1xf32>
    %135 = math.rsqrt %134 : vector<8x1xf32>
    %136 = vector.broadcast %135 : vector<8x1xf32> to vector<8x32xf32>
    %137 = arith.mulf %127, %136 : vector<8x32xf32>
    %138 = vector.broadcast %120 : vector<1x32xf32> to vector<8x32xf32>
    %139 = arith.mulf %137, %138 : vector<8x32xf32>
    %140 = vector.broadcast %121 : vector<1x32xf32> to vector<8x32xf32>
    %141 = arith.addf %139, %140 : vector<8x32xf32>
    %cst_57 = arith.constant 0.000000e+00 : f32
    %142 = vector.broadcast %cst_57 : f32 to vector<8x32xf32>
    %c2_i32_58 = arith.constant 2 : i32
    %143 = tpu.dynamic_rotate %141 by %c2_i32_58 dim 0 : vector<8x32xf32>, i32 -> vector<8x32xf32>
    %c-2_i32_59 = arith.constant -2 : i32
    %144 = vector.broadcast %c-2_i32_59 : i32 to vector<8x1xi32>
    %145 = arith.addi %4, %144 : vector<8x1xi32>
    %c0_i32_60 = arith.constant 0 : i32
    %146 = vector.broadcast %c0_i32_60 : i32 to vector<8x1xi32>
    %147 = arith.cmpi sge, %145, %146 : vector<8x1xi32>
    %c-2_i32_61 = arith.constant -2 : i32
    %148 = vector.broadcast %c-2_i32_61 : i32 to vector<8x1xi32>
    %149 = arith.addi %4, %148 : vector<8x1xi32>
    %c8_i32_62 = arith.constant 8 : i32
    %150 = vector.broadcast %c8_i32_62 : i32 to vector<8x1xi32>
    %151 = arith.cmpi slt, %149, %150 : vector<8x1xi32>
    %152 = arith.andi %147, %151 : vector<8x1xi1>
    %cst_63 = arith.constant 0.000000e+00 : f32
    %153 = vector.shape_cast %152 : vector<8x1xi1> to vector<8x1xi1>
    %154 = vector.broadcast %153 : vector<8x1xi1> to vector<8x32xi1>
    %155 = vector.broadcast %cst_63 : f32 to vector<8x32xf32>
    %156 = arith.select %154, %143, %155 : vector<8x32xi1>, vector<8x32xf32>
    %c0_64 = arith.constant 0 : index
    %c0_65 = arith.constant 0 : index
    %c0_66 = arith.constant 0 : index
    %157 = vector.load %arg11[%c0_64, %c0_65, %c0_66] : memref<5x1x32xf32, #tpu.memory_space<vmem>>, vector<1x1x32xf32>
    %158 = vector.shape_cast %157 : vector<1x1x32xf32> to vector<1x32xf32>
    %159 = vector.broadcast %158 : vector<1x32xf32> to vector<8x32xf32>
    %160 = arith.mulf %156, %159 : vector<8x32xf32>
    %161 = arith.addf %142, %160 : vector<8x32xf32>
    %c1_i32_67 = arith.constant 1 : i32
    %162 = tpu.dynamic_rotate %141 by %c1_i32_67 dim 0 : vector<8x32xf32>, i32 -> vector<8x32xf32>
    %c-1_i32_68 = arith.constant -1 : i32
    %163 = vector.broadcast %c-1_i32_68 : i32 to vector<8x1xi32>
    %164 = arith.addi %4, %163 : vector<8x1xi32>
    %c0_i32_69 = arith.constant 0 : i32
    %165 = vector.broadcast %c0_i32_69 : i32 to vector<8x1xi32>
    %166 = arith.cmpi sge, %164, %165 : vector<8x1xi32>
    %c-1_i32_70 = arith.constant -1 : i32
    %167 = vector.broadcast %c-1_i32_70 : i32 to vector<8x1xi32>
    %168 = arith.addi %4, %167 : vector<8x1xi32>
    %c8_i32_71 = arith.constant 8 : i32
    %169 = vector.broadcast %c8_i32_71 : i32 to vector<8x1xi32>
    %170 = arith.cmpi slt, %168, %169 : vector<8x1xi32>
    %171 = arith.andi %166, %170 : vector<8x1xi1>
    %cst_72 = arith.constant 0.000000e+00 : f32
    %172 = vector.shape_cast %171 : vector<8x1xi1> to vector<8x1xi1>
    %173 = vector.broadcast %172 : vector<8x1xi1> to vector<8x32xi1>
    %174 = vector.broadcast %cst_72 : f32 to vector<8x32xf32>
    %175 = arith.select %173, %162, %174 : vector<8x32xi1>, vector<8x32xf32>
    %c1_73 = arith.constant 1 : index
    %c0_74 = arith.constant 0 : index
    %c0_75 = arith.constant 0 : index
    %176 = vector.load %arg11[%c1_73, %c0_74, %c0_75] : memref<5x1x32xf32, #tpu.memory_space<vmem>>, vector<1x1x32xf32>
    %177 = vector.shape_cast %176 : vector<1x1x32xf32> to vector<1x32xf32>
    %178 = vector.broadcast %177 : vector<1x32xf32> to vector<8x32xf32>
    %179 = arith.mulf %175, %178 : vector<8x32xf32>
    %180 = arith.addf %161, %179 : vector<8x32xf32>
    %c2_76 = arith.constant 2 : index
    %c0_77 = arith.constant 0 : index
    %c0_78 = arith.constant 0 : index
    %181 = vector.load %arg11[%c2_76, %c0_77, %c0_78] : memref<5x1x32xf32, #tpu.memory_space<vmem>>, vector<1x1x32xf32>
    %182 = vector.shape_cast %181 : vector<1x1x32xf32> to vector<1x32xf32>
    %183 = vector.broadcast %182 : vector<1x32xf32> to vector<8x32xf32>
    %184 = arith.mulf %141, %183 : vector<8x32xf32>
    %185 = arith.addf %180, %184 : vector<8x32xf32>
    %c7_i32_79 = arith.constant 7 : i32
    %186 = tpu.dynamic_rotate %141 by %c7_i32_79 dim 0 : vector<8x32xf32>, i32 -> vector<8x32xf32>
    %c1_i32_80 = arith.constant 1 : i32
    %187 = vector.broadcast %c1_i32_80 : i32 to vector<8x1xi32>
    %188 = arith.addi %4, %187 : vector<8x1xi32>
    %c0_i32_81 = arith.constant 0 : i32
    %189 = vector.broadcast %c0_i32_81 : i32 to vector<8x1xi32>
    %190 = arith.cmpi sge, %188, %189 : vector<8x1xi32>
    %c1_i32_82 = arith.constant 1 : i32
    %191 = vector.broadcast %c1_i32_82 : i32 to vector<8x1xi32>
    %192 = arith.addi %4, %191 : vector<8x1xi32>
    %c8_i32_83 = arith.constant 8 : i32
    %193 = vector.broadcast %c8_i32_83 : i32 to vector<8x1xi32>
    %194 = arith.cmpi slt, %192, %193 : vector<8x1xi32>
    %195 = arith.andi %190, %194 : vector<8x1xi1>
    %cst_84 = arith.constant 0.000000e+00 : f32
    %196 = vector.shape_cast %195 : vector<8x1xi1> to vector<8x1xi1>
    %197 = vector.broadcast %196 : vector<8x1xi1> to vector<8x32xi1>
    %198 = vector.broadcast %cst_84 : f32 to vector<8x32xf32>
    %199 = arith.select %197, %186, %198 : vector<8x32xi1>, vector<8x32xf32>
    %c3_85 = arith.constant 3 : index
    %c0_86 = arith.constant 0 : index
    %c0_87 = arith.constant 0 : index
    %200 = vector.load %arg11[%c3_85, %c0_86, %c0_87] : memref<5x1x32xf32, #tpu.memory_space<vmem>>, vector<1x1x32xf32>
    %201 = vector.shape_cast %200 : vector<1x1x32xf32> to vector<1x32xf32>
    %202 = vector.broadcast %201 : vector<1x32xf32> to vector<8x32xf32>
    %203 = arith.mulf %199, %202 : vector<8x32xf32>
    %204 = arith.addf %185, %203 : vector<8x32xf32>
    %c6_i32_88 = arith.constant 6 : i32
    %205 = tpu.dynamic_rotate %141 by %c6_i32_88 dim 0 : vector<8x32xf32>, i32 -> vector<8x32xf32>
    %c2_i32_89 = arith.constant 2 : i32
    %206 = vector.broadcast %c2_i32_89 : i32 to vector<8x1xi32>
    %207 = arith.addi %4, %206 : vector<8x1xi32>
    %c0_i32_90 = arith.constant 0 : i32
    %208 = vector.broadcast %c0_i32_90 : i32 to vector<8x1xi32>
    %209 = arith.cmpi sge, %207, %208 : vector<8x1xi32>
    %c2_i32_91 = arith.constant 2 : i32
    %210 = vector.broadcast %c2_i32_91 : i32 to vector<8x1xi32>
    %211 = arith.addi %4, %210 : vector<8x1xi32>
    %c8_i32_92 = arith.constant 8 : i32
    %212 = vector.broadcast %c8_i32_92 : i32 to vector<8x1xi32>
    %213 = arith.cmpi slt, %211, %212 : vector<8x1xi32>
    %214 = arith.andi %209, %213 : vector<8x1xi1>
    %cst_93 = arith.constant 0.000000e+00 : f32
    %215 = vector.shape_cast %214 : vector<8x1xi1> to vector<8x1xi1>
    %216 = vector.broadcast %215 : vector<8x1xi1> to vector<8x32xi1>
    %217 = vector.broadcast %cst_93 : f32 to vector<8x32xf32>
    %218 = arith.select %216, %205, %217 : vector<8x32xi1>, vector<8x32xf32>
    %c4_94 = arith.constant 4 : index
    %c0_95 = arith.constant 0 : index
    %c0_96 = arith.constant 0 : index
    %219 = vector.load %arg11[%c4_94, %c0_95, %c0_96] : memref<5x1x32xf32, #tpu.memory_space<vmem>>, vector<1x1x32xf32>
    %220 = vector.shape_cast %219 : vector<1x1x32xf32> to vector<1x32xf32>
    %221 = vector.broadcast %220 : vector<1x32xf32> to vector<8x32xf32>
    %222 = arith.mulf %218, %221 : vector<8x32xf32>
    %223 = arith.addf %204, %222 : vector<8x32xf32>
    %c0_97 = arith.constant 0 : index
    %c0_98 = arith.constant 0 : index
    %224 = vector.load %arg12[%c0_97, %c0_98] : memref<1x32xf32, #tpu.memory_space<vmem>>, vector<1x32xf32>
    %225 = vector.broadcast %224 : vector<1x32xf32> to vector<8x32xf32>
    %226 = arith.addf %223, %225 : vector<8x32xf32>
    %c0_99 = arith.constant 0 : index
    %c0_100 = arith.constant 0 : index
    %227 = vector.load %arg13[%c0_99, %c0_100] : memref<32x32xf32, #tpu.memory_space<vmem>>, vector<32x32xf32>
    %cst_101 = arith.constant dense<0.000000e+00> : vector<8x32xf32>
    %228 = tpu.matmul %226, %227, %cst_101 {dimension_numbers = #tpu.dot_dimension_numbers<[1], [0], [0], [1], [0, 0, 1, 1], [], []>} : vector<8x32xf32>, vector<32x32xf32>, vector<8x32xf32> -> vector<8x32xf32>
    %c0_102 = arith.constant 0 : index
    %c0_103 = arith.constant 0 : index
    %229 = vector.load %arg14[%c0_102, %c0_103] : memref<1x32xf32, #tpu.memory_space<vmem>>, vector<1x32xf32>
    %230 = vector.broadcast %229 : vector<1x32xf32> to vector<8x32xf32>
    %231 = arith.addf %228, %230 : vector<8x32xf32>
    %cst_104 = arith.constant 0.000000e+00 : f32
    %232 = vector.broadcast %cst_104 : f32 to vector<8x32xf32>
    %233 = arith.maximumf %231, %232 : vector<8x32xf32>
    %234 = arith.addf %119, %233 : vector<8x32xf32>
    %c0_105 = arith.constant 0 : index
    %c0_106 = arith.constant 0 : index
    %c0_107 = arith.constant 0 : index
    %235 = vector.load %arg15[%c0_105, %c0_106, %c0_107] : memref<1x8x32xf32, #tpu.memory_space<vmem>>, vector<1x8x32xf32>
    %236 = vector.shape_cast %235 : vector<1x8x32xf32> to vector<8x32xf32>
    %237 = vector.shape_cast %234 : vector<8x32xf32> to vector<1x8x32xf32>
    tpu.vector_store %arg15[%c0_105, %c0_106, %c0_107], %237 {strides = array<i32>} : memref<1x8x32xf32, #tpu.memory_space<vmem>>, vector<1x8x32xf32>,
    return
  }
  func.func @transform_0(%arg0: i32) -> (i32, i32, i32) {
    %c0_i32 = arith.constant 0 : i32
    %c0_i32_0 = arith.constant 0 : i32
    %c0_i32_1 = arith.constant 0 : i32
    return %arg0, %c0_i32, %c0_i32_0 : i32, i32, i32
  }
  func.func @transform_1(%arg0: i32) -> (i32, i32) {
    %c0_i32 = arith.constant 0 : i32
    %c0_i32_0 = arith.constant 0 : i32
    %c0_i32_1 = arith.constant 0 : i32
    return %c0_i32, %c0_i32_0 : i32, i32
  }
  func.func @transform_2(%arg0: i32) -> (i32, i32) {
    %c0_i32 = arith.constant 0 : i32
    %c0_i32_0 = arith.constant 0 : i32
    %c0_i32_1 = arith.constant 0 : i32
    return %c0_i32, %c0_i32_0 : i32, i32
  }
  func.func @transform_3(%arg0: i32) -> (i32, i32) {
    %c0_i32 = arith.constant 0 : i32
    %c0_i32_0 = arith.constant 0 : i32
    %c0_i32_1 = arith.constant 0 : i32
    return %c0_i32, %c0_i32_0 : i32, i32
  }
  func.func @transform_4(%arg0: i32) -> (i32, i32, i32) {
    %c0_i32 = arith.constant 0 : i32
    %c0_i32_0 = arith.constant 0 : i32
    %c0_i32_1 = arith.constant 0 : i32
    %c0_i32_2 = arith.constant 0 : i32
    return %c0_i32, %c0_i32_0, %c0_i32_1 : i32, i32, i32
  }
  func.func @transform_5(%arg0: i32) -> (i32, i32) {
    %c0_i32 = arith.constant 0 : i32
    %c0_i32_0 = arith.constant 0 : i32
    %c0_i32_1 = arith.constant 0 : i32
    return %c0_i32, %c0_i32_0 : i32, i32
  }
  func.func @transform_6(%arg0: i32) -> (i32, i32) {
    %c0_i32 = arith.constant 0 : i32
    %c0_i32_0 = arith.constant 0 : i32
    %c0_i32_1 = arith.constant 0 : i32
    return %c0_i32, %c0_i32_0 : i32, i32
  }
  func.func @transform_7(%arg0: i32) -> (i32, i32) {
    %c0_i32 = arith.constant 0 : i32
    %c0_i32_0 = arith.constant 0 : i32
    %c0_i32_1 = arith.constant 0 : i32
    return %c0_i32, %c0_i32_0 : i32, i32
  }
  func.func @transform_8(%arg0: i32) -> (i32, i32) {
    %c0_i32 = arith.constant 0 : i32
    %c0_i32_0 = arith.constant 0 : i32
    %c0_i32_1 = arith.constant 0 : i32
    return %c0_i32, %c0_i32_0 : i32, i32
  }
  func.func @transform_9(%arg0: i32) -> (i32, i32) {
    %c0_i32 = arith.constant 0 : i32
    %c0_i32_0 = arith.constant 0 : i32
    %c0_i32_1 = arith.constant 0 : i32
    return %c0_i32, %c0_i32_0 : i32, i32
  }
  func.func @transform_10(%arg0: i32) -> (i32, i32, i32) {
    %c0_i32 = arith.constant 0 : i32
    %c0_i32_0 = arith.constant 0 : i32
    %c0_i32_1 = arith.constant 0 : i32
    %c0_i32_2 = arith.constant 0 : i32
    return %c0_i32, %c0_i32_0, %c0_i32_1 : i32, i32, i32
  }
  func.func @transform_11(%arg0: i32) -> (i32, i32) {
    %c0_i32 = arith.constant 0 : i32
    %c0_i32_0 = arith.constant 0 : i32
    %c0_i32_1 = arith.constant 0 : i32
    return %c0_i32, %c0_i32_0 : i32, i32
  }
  func.func @transform_12(%arg0: i32) -> (i32, i32) {
    %c0_i32 = arith.constant 0 : i32
    %c0_i32_0 = arith.constant 0 : i32
    %c0_i32_1 = arith.constant 0 : i32
    return %c0_i32, %c0_i32_0 : i32, i32
  }
  func.func @transform_13(%arg0: i32) -> (i32, i32) {
    %c0_i32 = arith.constant 0 : i32
    %c0_i32_0 = arith.constant 0 : i32
    %c0_i32_1 = arith.constant 0 : i32
    return %c0_i32, %c0_i32_0 : i32, i32
  }
  func.func @transform_14(%arg0: i32) -> (i32, i32, i32) {
    %c0_i32 = arith.constant 0 : i32
    %c0_i32_0 = arith.constant 0 : i32
    %c0_i32_1 = arith.constant 0 : i32
    return %arg0, %c0_i32, %c0_i32_0 : i32, i32, i32
  }
}

</mosaic_0001>

<bundles_post_ra>
// kernel: encoder_block_forward.2
= control target key start
LH: loop header
LB: loop body
LE: loop exit
PB: predicated region body
PF: predicated region fallthrough
CT: control target
= control target key end

     0   :  { %s1909_s0 = inlined_call_operand.hbm [shape: f32[2,8,32], index: 0, kind: input, shape index: {}]   ;;  %s1910_s1 = inlined_call_operand.vmem [shape: f32[8,32], index: 1, kind: input, shape index: {}]   ;;  %s1911_s2 = inlined_call_operand.vmem [shape: f32[1,32], index: 2, kind: input, shape index: {}]   ;;  %s1912_s3 = inlined_call_operand.vmem [shape: f32[1,32], index: 3, kind: input, shape index: {}]   ;;  %s1913_s4 = inlined_call_operand.vmem [shape: f32[5,1,32], index: 4, kind: input, shape index: {}]   ;;  %s1914_s5 = inlined_call_operand.hbm [shape: f32[1,32], index: 5, kind: input, shape index: {}]   ;;  %s1915_s6 = inlined_call_operand.vmem [shape: f32[32,32], index: 6, kind: input, shape index: {}]   ;;  %s1916_s7 = inlined_call_operand.hbm [shape: f32[1,32], index: 7, kind: input, shape index: {}]   ;;  %s1917_s8 = inlined_call_operand.vmem [shape: f32[1,32], index: 8, kind: input, shape index: {}]   ;;  %s1918_s9 = inlined_call_operand.hbm [shape: f32[1,32], index: 9, kind: input, shape index: {}]   ;;  %s1919_s10 = inlined_call_operand.vmem [shape: f32[5,1,32], index: 10, kind: input, shape index: {}]   ;;  %s1920_s11 = inlined_call_operand.hbm [shape: f32[1,32], index: 11, kind: input, shape index: {}]   ;;  %s1921_s12 = inlined_call_operand.vmem [shape: f32[32,32], index: 12, kind: input, shape index: {}]   ;;  %s1922_s13 = inlined_call_operand.hbm [shape: f32[1,32], index: 13, kind: input, shape index: {}]   ;;  %s1923_s14 = inlined_call_operand.vmem [shape: f32[2,8,32], index: 14, kind: output, shape index: {}]  }
   0x1   :  { %1929 = sst [smem:[#allocation16_spill]] %s1913_s4 }
   0x2   :  { %1930 = sst [smem:[#allocation17_spill]] %s1917_s8 }
   0x3   :  { %1931 = sst [smem:[#allocation18_spill]] %s1919_s10 }
   0x4   :  { %1932 = sst [smem:[#allocation19_spill]] %s1921_s12 }
   0x5   :  { %1933 = sst [smem:[#allocation20_spill]] %s1923_s14 }
   0x6   :  { %19 = vsyncpa [#allocation3], 0 }
   0x7   :  { %21 = vsyncpa [#allocation3 + $0x1], 0 }
   0x8   :  { %22 = vsyncpa [#allocation5], 0 }
   0x9   :  { %23 = vsyncpa [#allocation8], 0 }
   0xa   :  { %24 = vsyncpa [#allocation11], 0  ;;  %s1542_s29 = smov 0   ;;  %s1544_s30 = smov 0  }
   0xb   :  { %s1546_s15 = smov 0   ;;  %s1548_s16 = smov 0  }
   0xc LB: > { %s1458_s17 = smov [#allocation4]   ;;  %s1563_s19 = sadd.s32 4294967295, %s1456_s16   ;;  %s1456_s16 = sphi %s1548_s16, %s1956_s16   ;;  %s1452_s15 = sphi %s1546_s15, %s1955_s15   ;;  %s1448_s30 = sphi %s1544_s30, %s1954_s30   ;;  %s1444_s29 = sphi %s1542_s29, %s1953_s29  }
   0xd   : > { %s385_s18 = sshll.u32 %s1458_s17, 4  ;;  %p1052_p0 = scmp.ge.s32.totalorder %s1456_s16, 1  ;;  %s1568_s18 = int_to_ptr.vmem [resolvable:$true] %s385_s18 }
   0xe   : > { %p1927_p1 = scmp.eq.s32.totalorder %s1563_s19, 0  ;;  %p360_p2 = scmp.lt.s32.totalorder %s1456_s16, 3 }
   0xf   : > { %s1459_s21 = smov [#allocation7]   ;;  %s1460_s23 = smov [#allocation6]  }
  0x10   : > { %p1570_p3 = pnand %p1052_p0, %p360_p2  ;;  %s413_s22 = sshll.u32 %s1459_s21, 4  ;;  %s1576_s22 = int_to_ptr.vmem [resolvable:$true] %s413_s22 }
  0x11   : > { %s399_s24 = sshll.u32 %s1460_s23, 4  ;;  %s1461_s26 = smov [#allocation9]   ;;  %s1584_s24 = int_to_ptr.vmem [resolvable:$true] %s399_s24 }
  0x12   : > { %s1934_s20 = scalar_select %p1570_p3, 1, 0 }
  0x13   : > { %p1165_p4 = pneg %p1570_p3  ;;  %s1586_s27 = sshll.u32 %s1461_s26, 4  ;;  %s428_s27 = int_to_ptr.vmem [resolvable:$true] %s1586_s27 }
  0x14   : > { %s1240_s14 = scalar_lea.hbm %s1914_s5, 16 }
  0x15   : > { %p1580_p5 = pnand %p1165_p4, %p1927_p1  ;;  %p1241_p6 = scmp.ne.s32.totalorder %s1914_s5, %s1240_s14 }
  0x16   : > { %p1247_p10 = scmp.lt.u32.totalorder %s1240_s14, %s1914_s5 }
  0x17   : > { %p1596_p7 = pneg %p1580_p5 }
  0x19   : > { %p1243_p8 = pnand %p1596_p7, %p1241_p6 }
  0x1b   : > { %p1244_p9 = pneg %p1243_p8 }
  0x1d   : > { %p1249_p11 = pnand %p1247_p10, %p1244_p9 }
  0x1f   : > { %1252 = shalt.err (!%p1249_p11)
}
  0x20   : > { %s1253_s10 = scalar_lea.vmem %s1568_s18, 16  ;;  %s1260_s28 = scalar_lea.vmem %s1568_s18, 32 }
  0x21   : > { %p1254_p12 = scmp.ne.s32.totalorder %s1568_s18, %s1253_s10  ;;  %p1261_p2 = scmp.lt.s32.totalorder %s1568_s18, %s1568_s18 }
  0x22   : > { %p1262_p4 = scmp.lt.s32.totalorder %s1260_s28, %s1253_s10 }
  0x23   : > { %p1256_p13 = pnand %p1254_p12, %p1596_p7 }
  0x24   : > { %p1263_p6 = por %p1262_p4, %p1261_p2 }
  0x25   : > { %p1257_p0 = pneg %p1256_p13 }
  0x27   : > { %p1264_p8 = pnand %p1263_p6, %p1257_p0 }
  0x29   : > { %1267 = shalt.err (!%p1264_p8)
}
  0x2a   : > { %1168 = dma.hbm_to_vmem [thread:$0]  (!%p1580_p5), %s1914_s5, 16, %s1568_s18, [#allocation5]  }
  0x2b   : > { %s1268_s26 = scalar_lea.hbm %s1918_s9, 16 }
  0x2c   : > { %p1269_p9 = scmp.ne.s32.totalorder %s1918_s9, %s1268_s26  ;;  %p1275_p12 = scmp.lt.u32.totalorder %s1268_s26, %s1918_s9 }
  0x2e   : > { %p1271_p10 = pnand %p1269_p9, %p1596_p7 }
  0x30   : > { %p1272_p11 = pneg %p1271_p10 }
  0x32   : > { %p1277_p13 = pnand %p1275_p12, %p1272_p11 }
  0x34   : > { %1280 = shalt.err (!%p1277_p13)
}
  0x35   : > { %s1281_s18 = scalar_lea.vmem %s1576_s22, 16  ;;  %s1288_s4 = scalar_lea.vmem %s1576_s22, 32 }
  0x36   : > { %p1282_p0 = scmp.ne.s32.totalorder %s1576_s22, %s1281_s18  ;;  %p1289_p6 = scmp.lt.s32.totalorder %s1576_s22, %s1576_s22 }
  0x37   : > { %p1290_p8 = scmp.lt.s32.totalorder %s1288_s4, %s1281_s18 }
  0x38   : > { %p1284_p2 = pnand %p1282_p0, %p1596_p7 }
  0x39   : > { %p1291_p9 = por %p1290_p8, %p1289_p6 }
  0x3a   : > { %p1285_p4 = pneg %p1284_p2 }
  0x3c   : > { %p1292_p10 = pnand %p1291_p9, %p1285_p4 }
  0x3e   : > { %1295 = shalt.err (!%p1292_p10)
}
  0x3f   : > { %1174 = dma.hbm_to_vmem [thread:$0]  (!%p1580_p5), %s1918_s9, 16, %s1576_s22, [#allocation8]  }
  0x40   : > { %s1296_s21 = scalar_lea.hbm %s1916_s7, 16 }
  0x41   : > { %p1297_p11 = scmp.ne.s32.totalorder %s1916_s7, %s1296_s21  ;;  %p1303_p0 = scmp.lt.u32.totalorder %s1296_s21, %s1916_s7 }
  0x43   : > { %p1299_p12 = pnand %p1297_p11, %p1596_p7 }
  0x45   : > { %p1300_p13 = pneg %p1299_p12 }
  0x47   : > { %p1305_p2 = pnand %p1303_p0, %p1300_p13 }
  0x49   : > { %1308 = shalt.err (!%p1305_p2)
}
  0x4a   : > { %s1309_s22 = scalar_lea.vmem %s1584_s24, 16  ;;  %s1316_s4 = scalar_lea.vmem %s1584_s24, 32 }
  0x4b   : > { %p1310_p4 = scmp.ne.s32.totalorder %s1584_s24, %s1309_s22  ;;  %p1317_p9 = scmp.lt.s32.totalorder %s1584_s24, %s1584_s24 }
  0x4c   : > { %p1318_p10 = scmp.lt.s32.totalorder %s1316_s4, %s1309_s22 }
  0x4d   : > { %p1312_p6 = pnand %p1310_p4, %p1596_p7 }
  0x4e   : > { %p1319_p11 = por %p1318_p10, %p1317_p9 }
  0x4f   : > { %p1313_p8 = pneg %p1312_p6 }
  0x51   : > { %p1320_p12 = pnand %p1319_p11, %p1313_p8 }
  0x53   : > { %1323 = shalt.err (!%p1320_p12)
}
  0x54   : > { %1171 = dma.hbm_to_vmem [thread:$0]  (!%p1580_p5), %s1916_s7, 16, %s1584_s24, [#allocation5]  }
  0x55   : > { %s1462_s14 = smov [#allocation10]   ;;  %s1324_s10 = scalar_lea.hbm %s1920_s11, 16 }
  0x56   : > { %s441_s17 = sshll.u32 %s1462_s14, 4  ;;  %p1325_p13 = scmp.ne.s32.totalorder %s1920_s11, %s1324_s10  ;;  %s442_s17 = int_to_ptr.vmem [resolvable:$true] %s441_s17 }
  0x57   : > { %p1331_p4 = scmp.lt.u32.totalorder %s1324_s10, %s1920_s11 }
  0x58   : > { %p1327_p0 = pnand %p1325_p13, %p1596_p7 }
  0x5a   : > { %p1328_p2 = pneg %p1327_p0 }
  0x5c   : > { %p1333_p6 = pnand %p1331_p4, %p1328_p2 }
  0x5e   : > { %1336 = shalt.err (!%p1333_p6)
}
  0x5f   : > { %s1337_s24 = scalar_lea.vmem %s428_s27, 16  ;;  %s1344_s12 = scalar_lea.vmem %s428_s27, 32 }
  0x60   : > { %p1338_p8 = scmp.ne.s32.totalorder %s428_s27, %s1337_s24  ;;  %p1345_p11 = scmp.lt.s32.totalorder %s428_s27, %s428_s27 }
  0x61   : > { %p1346_p12 = scmp.lt.s32.totalorder %s1344_s12, %s1337_s24 }
  0x62   : > { %p1340_p9 = pnand %p1338_p8, %p1596_p7 }
  0x63   : > { %p1347_p1 = por %p1346_p12, %p1345_p11 }
  0x64   : > { %p1341_p10 = pneg %p1340_p9 }
  0x66   : > { %p1348_p3 = pnand %p1347_p1, %p1341_p10 }
  0x68   : > { %1351 = shalt.err (!%p1348_p3)
}
  0x69   : > { %1177 = dma.hbm_to_vmem [thread:$0]  (!%p1580_p5), %s1920_s11, 16, %s428_s27, [#allocation8]  }
  0x6a   : > { %s1352_s10 = scalar_lea.hbm %s1922_s13, 16 }
  0x6b   : > { %p1353_p13 = scmp.ne.s32.totalorder %s1922_s13, %s1352_s10  ;;  %p1359_p3 = scmp.lt.u32.totalorder %s1352_s10, %s1922_s13 }
  0x6d   : > { %p1355_p0 = pnand %p1353_p13, %p1596_p7 }
  0x6f   : > { %p1356_p1 = pneg %p1355_p0 }
  0x71   : > { %p1361_p2 = pnand %p1359_p3, %p1356_p1 }
  0x73   : > { %1364 = shalt.err (!%p1361_p2)
}
  0x74   : > { %s1365_s24 = scalar_lea.vmem %s442_s17, 16  ;;  %s1372_s27 = scalar_lea.vmem %s442_s17, 32 }
  0x75   : > { %p1366_p4 = scmp.ne.s32.totalorder %s442_s17, %s1365_s24  ;;  %p1373_p9 = scmp.lt.s32.totalorder %s442_s17, %s442_s17 }
  0x76   : > { %p1374_p10 = scmp.lt.s32.totalorder %s1372_s27, %s1365_s24 }
  0x77   : > { %p1368_p6 = pnand %p1366_p4, %p1596_p7 }
  0x78   : > { %p1375_p11 = por %p1374_p10, %p1373_p9 }
  0x79   : > { %p1369_p8 = pneg %p1368_p6 }
  0x7b   : > { %p1376_p12 = pnand %p1375_p11, %p1369_p8 }
  0x7d   : > { %1379 = shalt.err (!%p1376_p12)
}
  0x7e   : > { %1180 = dma.hbm_to_vmem [thread:$0]  (!%p1580_p5), %s1922_s13, 16, %s442_s17, [#allocation11]  }
  0x7f   : > { %s1704_s23 = sadd.s32 1, %s1456_s16   ;;  %s37_s14 = sadd.s32 1, %s1452_s15 }
  0x80   : > { %s34_s25 = ssub.s32 %s1456_s16, %s1704_s23  ;;  %p44_p13 = scmp.ne.s32.totalorder %s1452_s15, %s1448_s30 }
  0x81   : > { %p35_p7 = scmp.eq.s32.totalorder %s34_s25, 0  ;;  %p45_p0 = scmp.eq.s32.totalorder %s1456_s16, 0 }
  0x82   : > { %p50_p1 = scmp.ne.s32.totalorder %s1448_s30, %s1444_s29  ;;  %p1937_p2 = scmp.eq.s32.totalorder %s1563_s19, 0 }
  0x83   : > { %s1715_s21 = scalar_select %p35_p7, %s1452_s15, %s37_s14  }
  0x84   : > { %p46_p3 = por %p45_p0, %p44_p13  ;;  %p1719_p4 = por %p1937_p2, %p50_p1 }
  0x85   : > { %p1190_p6 = scmp.lt.s32.totalorder %s1456_s16, 2  ;;  %s452_s10 = sand.u32 1, %s1452_s15  }
  0x86   : > { %s1059_s17 = sshll.u32 %s452_s10, 3  ;;  %s1060_s28 = sshll.u32 %s1456_s16, 7 }
  0x87   : > { %s1729_s4 = scalar_lea.hbm %s1909_s0, %s1060_s28  ;;  %s456_s29 = scalar_lea.vmem [#allocation2], %s1059_s17 }
  0x88   : > { %s463_s24 = sshll.u32 %s456_s29, 4  ;;  %p1733_p5 = pnand %p1190_p6, %p46_p3  ;;  %s1731_s24 = int_to_ptr.vmem [resolvable:$true] %s463_s24 }
  0x89   : > { %s453_s16 = scalar_lea.sflag [#allocation3], %s452_s10  ;;  %s1380_s12 = scalar_lea.hbm %s1729_s4, 128 }
  0x8a   : > { %p1381_p8 = scmp.ne.s32.totalorder %s1729_s4, %s1380_s12  ;;  %p1382_p9 = pneg %p1733_p5 }
  0x8b   : > { %s1385_s14 = scalar_lea.hbm %s1909_s0, 256  ;;  %p1386_p12 = scmp.lt.u32.totalorder %s1729_s4, %s1909_s0 }
  0x8c   : > { %p1383_p10 = pnand %p1382_p9, %p1381_p8  ;;  %p1387_p7 = scmp.lt.u32.totalorder %s1385_s14, %s1380_s12 }
  0x8d   : > { %p1389_p0 = scmp.lt.u32.totalorder %s1380_s12, %s1729_s4 }
  0x8e   : > { %p1384_p11 = pneg %p1383_p10  ;;  %p1388_p13 = por %p1387_p7, %p1386_p12 }
  0x90   : > { %p1390_p1 = por %p1389_p0, %p1388_p13 }
  0x92   : > { %p1391_p3 = pnand %p1390_p1, %p1384_p11 }
  0x94   : > { %1394 = shalt.err (!%p1391_p3)
}
  0x95   : > { %s1395_s10 = scalar_lea.vmem %s1731_s24, 128  ;;  %s1463_s18 = smov [#allocation2]  }
  0x96   : > { %p1396_p2 = scmp.ne.s32.totalorder %s1731_s24, %s1395_s10  ;;  %s1400_s22 = sshll.u32 %s1463_s18, 4  ;;  %s1401_s22 = int_to_ptr.vmem [resolvable:$false] %s1400_s22 }
  0x97   : > { %s1402_s29 = scalar_lea.vmem %s1401_s22, 256  ;;  %p1403_p10 = scmp.lt.s32.totalorder %s1731_s24, %s1401_s22 }
  0x98   : > { %p1398_p6 = pnand %p1396_p2, %p1382_p9  ;;  %p1404_p12 = scmp.lt.s32.totalorder %s1402_s29, %s1395_s10 }
  0x9a   : > { %p1399_p8 = pneg %p1398_p6  ;;  %p1405_p7 = por %p1404_p12, %p1403_p10 }
  0x9c   : > { %p1406_p13 = pnand %p1405_p7, %p1399_p8 }
  0x9e   : > { %1409 = shalt.err (!%p1406_p13)
}
  0x9f   : > { %1184 = dma.hbm_to_vmem [thread:$0]  (!%p1733_p5), %s1729_s4, 128, %s1731_s24, %s453_s16  }
  0xa0   : > { %p1940_p11 = scmp.ne.s32.totalorder %s1934_s20, 0 }
  0xa1   : > { %s474_s12 = sand.u32 (!%p1940_p11), 1, %s1448_s30  }
  0xa2   : > { %472 = sbr.rel (%p1940_p11) target bundleno = 1277 (0x4fd), region = 76  ;;  %s1062_s8 = sshll.u32 (!%p1940_p11), %s474_s12, 3 }
  0xa3   : > { %s475_s25 = scalar_lea.sflag (!%p1940_p11), [#allocation3], %s474_s12  ;;  %s478_s14 = scalar_lea.vmem (!%p1940_p11), [#allocation2], %s1062_s8 }
  0xa9   : > { %1427 = dma.done.wait (%p1719_p4), %s475_s25, 128  }
  0xaa   : > { %1429 = vsyncadd (%p1719_p4), %s475_s25, 4294967168  ;;  %p1941_p9 = scmp.eq.s32.totalorder %s1563_s19, 0 }
  0xac   : > { %1431 = dma.done.wait (%p1941_p9), [#allocation5], 32   ;;  %p1942_p0 = pmov %p1941_p9 }
  0xae   : > { %1433 = vsyncadd (%p1942_p0), [#allocation5], 4294967264  ;;  %p1943_p5 = pmov %p1942_p0 }
  0xaf   : > { %p1944_p1 = pmov %p1942_p0 }
  0xb0   : > { %1435 = dma.done.wait (%p1943_p5), [#allocation8], 32  }
  0xb1   : > { %1437 = vsyncadd (%p1944_p1), [#allocation8], 4294967264  ;;  %p1945_p3 = pmov %p1942_p0 }
  0xb2   : > { %p1946_p2 = pmov %p1942_p0 }
  0xb3   : > { %1439 = dma.done.wait (%p1945_p3), [#allocation11], 16  }
  0xb4   : > { %1441 = vsyncadd (%p1946_p2), [#allocation11], 4294967280  ;;  %v546_v0 = vld [vmem:[%s478_s14] sm:$0xff]  ;;  %vm553_vm0 = vcmask 261120   ;;  %v673_v11 = vld [vmem:[%s1915_s6 + $0x10] sm:$0xff]  ;;  %v1464_v12 = vmov 0.0|0.0   ;;  %v549_v20 = vlaneseq }
  0xb5   : > { %v547_v1 = vld [vmem:[%s1910_s1] sm:$0xff]  ;;  %v672_v10 = vld [vmem:[%s1915_s6 + $0x8] sm:$0xff]  ;;  %1131 = vmatprep.subr.bf16.mxu0 %v1464_v12  ;;  %v674_v14 = vld [vmem:[%s1915_s6 + $0x18] sm:$0xff]  ;;  %vm1465_vm1 = vmmov 0   ;;  %v1466_v15 = vmov 0.0   ;;  %1137 = vmatprep.subr.bf16.mxu1 %v1464_v12  ;;  %s1947_s20 = sld [smem:[#allocation16_spill]] }
  0xb6   : > { %v1784_v2 = vadd.f32 %v547_v1, %v546_v0  ;;  %v671_v9 = vld [vmem:[%s1915_s6] sm:$0xff]  ;;  %1117 = vmatprep.mubr.msk.f32.mxu0 %vm1465_vm1, %v1466_v15  ;;  %1128 = vmatprep.mubr.msk.f32.mxu1 %vm1465_vm1, %v1466_v15  ;;  %v1135_v16 = vpack.c.bf16 %v674_v14, %v673_v11  ;;  %v550_v21 = vshrl.u32 %v549_v20, 7  ;;  %v1080_v53 = vld [vmem:[#allocation4] ss:$0 sm:$0xff]  ;;  %v1081_v56 = vld [vmem:[#allocation6] ss:$0 sm:$0xff] }
  0xb7   : > { %v1132_v13 = vpack.c.bf16 %v672_v10, %v671_v9  ;;  %v1069_v23 = vld [vmem:[%s1911_s2] ss:$0 sm:$0xff]  ;;  %s1948_s29 = sld [smem:[#allocation19_spill]]  ;;  %s1950_s17 = sld [smem:[#allocation17_spill]] }
  0xb8   : > { %v554_v3 = vsel %vm553_vm0, %v1784_v2, 0.0  ;;  %v1070_v25 = vld [vmem:[%s1912_s3] ss:$0 sm:$0xff]  ;;  %v1811_v26 = vadd.s32 4294967294, %v550_v21  ;;  %v1813_v27 = vadd.s32 4294967295, %v550_v21  ;;  %v1815_v29 = vadd.s32 1, %v550_v21 }
  0xb9   : > { %555 = vadd.xlane.f32.xlu0 %v554_v3  ;;  %1133 = vmatpush3.bf16.msra.mxu0 %v1132_v13  ;;  %v1822_v32 = vadd.s32 2, %v550_v21  ;;  %s1951_s18 = sld [smem:[#allocation18_spill]]  ;;  %p542_p4 = scmp.lt.s32.totalorder %s1563_s19, 1 }
  0xba   : > { %1134 = vmatprep.subr.bf16.mxu0 %v1464_v12  ;;  %vm584_vm2 = vcmp.ge.s32.totalorder %v1811_v26, 0  ;;  %vm601_vm3 = vcmp.ge.s32.totalorder %v1813_v27, 0  ;;  %vm630_vm4 = vcmp.lt.s32.totalorder %v1815_v29, 8  ;;  %v1094_v29 = vld [vmem:[#allocation9] ss:$0 sm:$0xff]  ;;  %s1952_s28 = sld [smem:[#allocation20_spill]] }
  0xbb   : > { %v1071_v31 = vld [vmem:[%s1947_s20] ss:$0 sm:$0xff]  ;;  %v1073_v35 = vld [vmem:[%s1947_s20 + $0x1] ss:$0 sm:$0xff]  ;;  %v1075_v39 = vld [vmem:[%s1947_s20 + $0x2] ss:$0 sm:$0xff] }
  0xbc   : > { %vm648_vm5 = vcmp.lt.s32.totalorder %v1822_v32, 8  ;;  %v1077_v44 = vld [vmem:[%s1947_s20 + $0x3] ss:$0 sm:$0xff]  ;;  %v1079_v48 = vld [vmem:[%s1947_s20 + $0x4] ss:$0 sm:$0xff]  ;;  %s1958_s19 = smov (!%p542_p4, %s1563_s19), 1 }
  0xbd   : > { %1136 = vmatpush3.bf16.msra.mxu0 %v1135_v16  ;;  %s1949_s12 = smov %s1948_s29  ;;  %v1083_v15 = vld [vmem:[%s1950_s17] ss:$0 sm:$0xff]  ;;  %s1068_s27 = sshll.u32 %s1958_s19, 3 }
  0xbf   : > { %v1085_v20 = vld [vmem:[%s1951_s18] ss:$0 sm:$0xff]  ;;  %v1091_v26 = vld [vmem:[%s1951_s18 + $0x3] ss:$0 sm:$0xff] }
  0xc0   : > { %s545_s10 = scalar_lea.vmem %s1952_s28, %s1068_s27 }
 0x146   : > { %v556_v4 = vpop.xlane.xlu0 %555 }
 0x147   : > { %v558_v5 = vmul.f32 0.03125, %v556_v4 }
 0x149   : > { %v559_v6 = vsub.f32 %v1784_v2, %v558_v5  ;;  %v851_v5 = vld [vmem:[%s1948_s29] sm:$0xff] }
 0x14b   : > { %v560_v7 = vmul.f32 %v559_v6, %v559_v6 }
 0x14d   : > { %v561_v8 = vsel %vm553_vm0, %v560_v7, 0.0 }
 0x14e   : > { %562 = vadd.xlane.f32.xlu0 %v561_v8  ;;  %v854_v8 = vld [vmem:[%s1949_s12 + $0x18] sm:$0xff] }
 0x1db   : > { %v563_v17 = vpop.xlane.xlu0 %562 }
 0x1dc   : > { %v564_v18 = vmul.f32 0.03125, %v563_v17  ;;  %v1084_v17 = vld [vmem:[#allocation7] ss:$0 sm:$0xff] }
 0x1de   : > { %v565_v19 = vadd.f32 1e-05, %v564_v18 }
 0x1e0   : > { %1236 = vrsqrt.f32 %v565_v19 }
 0x1ea   : > { %v1237_v22 = vpop.eup %1236 }
 0x1eb   : > { %v567_v24 = vmul.f32 %v1237_v22, %v559_v6  ;;  %v852_v6 = vld [vmem:[%s1949_s12 + $0x8] sm:$0xff]  ;;  %v1087_v22 = vld [vmem:[%s1951_s18 + $0x1] ss:$0 sm:$0xff] }
 0x1ec   : > { %v1138_v7 = vpack.c.bf16 %v852_v6, %v851_v5 }
 0x1ed   : > { %v574_v28 = vmul.f32 %v1069_v23, %v567_v24 }
 0x1ee   : > { %1139 = vmatpush3.bf16.msra.mxu1 %v1138_v7 }
 0x1ef   : > { %v581_v30 = vadd.f32 %v1070_v25, %v574_v28  ;;  %1140 = vmatprep.subr.bf16.mxu1 %v1464_v12  ;;  %v1089_v28 = vld [vmem:[%s1951_s18 + $0x2] ss:$0 sm:$0xff] }
 0x1f1   : > { %v582_v33 = vrot.slane %v581_v30, 6  ;;  %v599_v34 = vrot.slane %v581_v30, 7  ;;  %v627_v36 = vrot.slane %v581_v30, 1  ;;  %v645_v40 = vrot.slane %v581_v30, 2 }
 0x1f2   : > { %v625_v46 = vmul.f32 %v1075_v39, %v581_v30 }
 0x1f3   : > { %v589_v37 = vsel %vm584_vm2, %v582_v33, 0.0  ;;  %v606_v38 = vsel %vm601_vm3, %v599_v34, 0.0  ;;  %v634_v43 = vsel %vm630_vm4, %v627_v36, 0.0  ;;  %v652_v47 = vsel %vm648_vm5, %v645_v40, 0.0 }
 0x1f4   : > { %v597_v41 = vmul.f32 %v1071_v31, %v589_v37  ;;  %v615_v42 = vmul.f32 %v1073_v35, %v606_v38  ;;  %v643_v50 = vmul.f32 %v1077_v44, %v634_v43  ;;  %v661_v52 = vmul.f32 %v1079_v48, %v652_v47  ;;  %v1093_v37 = vld [vmem:[%s1951_s18 + $0x4] ss:$0 sm:$0xff]  ;;  %v1095_v44 = vld [vmem:[#allocation10] ss:$0 sm:$0xff] }
 0x1f6   : > { %v616_v45 = vadd.f32 %v615_v42, %v597_v41 }
 0x1f8   : > { %v626_v49 = vadd.f32 %v625_v46, %v616_v45 }
 0x1fa   : > { %v644_v51 = vadd.f32 %v643_v50, %v626_v49 }
 0x1fc   : > { %v662_v54 = vadd.f32 %v661_v52, %v644_v51 }
 0x1fe   : > { %v670_v55 = vadd.f32 %v1080_v53, %v662_v54 }
 0x200   : > { %1118 = vmatmul.mubr.msk.f32.vlgmr.msra.gmra.mrb[0].mxu0 %vm553_vm0, %v670_v55 }
 0x2d3   : > { %v751_v57 = vpop.f32.mrb[0].mxu0 }
 0x2d4   : > { %v752_v58 = vadd.f32 %v1081_v56, %v751_v57  ;;  %v1119_v59 = vpop.f32.mrb[1].mxu0 }
 0x2d6   : > { %v755_v60 = vmax.f32 %v752_v58, 0.0 }
 0x2d8   : > { %v756_v61 = vadd.f32 %v755_v60, %v1784_v2  ;;  %v853_v2 = vld [vmem:[%s1949_s12 + $0x10] sm:$0xff] }
 0x2d9   : > { %v1141_v9 = vpack.c.bf16 %v854_v8, %v853_v2 }
 0x2da   : > { %v759_v62 = vsel %vm553_vm0, %v756_v61, 0.0 }
 0x2db   : > { %760 = vadd.xlane.f32.xlu1 %v759_v62  ;;  %1142 = vmatpush3.bf16.msra.mxu1 %v1141_v9 }
 0x368   : > { %v761_v63 = vpop.xlane.xlu1 %760 }
 0x369   : > { %v762_v0 = vmul.f32 0.03125, %v761_v63 }
 0x36b   : > { %v763_v1 = vsub.f32 %v756_v61, %v762_v0 }
 0x36d   : > { %v764_v3 = vmul.f32 %v763_v1, %v763_v1 }
 0x36f   : > { %v765_v4 = vsel %vm553_vm0, %v764_v3, 0.0 }
 0x370   : > { %766 = vadd.xlane.f32.xlu1 %v765_v4 }
 0x3fd   : > { %v767_v10 = vpop.xlane.xlu1 %766 }
 0x3fe   : > { %v768_v11 = vmul.f32 0.03125, %v767_v10 }
 0x400   : > { %v769_v13 = vadd.f32 1e-05, %v768_v11 }
 0x402   : > { %1238 = vrsqrt.f32 %v769_v13 }
 0x40c   : > { %v1239_v14 = vpop.eup %1238 }
 0x40d   : > { %v771_v16 = vmul.f32 %v1239_v14, %v763_v1 }
 0x40f   : > { %v778_v18 = vmul.f32 %v1083_v15, %v771_v16 }
 0x411   : > { %v785_v19 = vadd.f32 %v1084_v17, %v778_v18 }
 0x413   : > { %v786_v21 = vrot.slane %v785_v19, 6  ;;  %v797_v12 = vrot.slane %v785_v19, 7  ;;  %v819_v23 = vrot.slane %v785_v19, 1  ;;  %v831_v30 = vrot.slane %v785_v19, 2 }
 0x414   : > { %v817_v36 = vmul.f32 %v1089_v28, %v785_v19 }
 0x415   : > { %v787_v24 = vsel %vm584_vm2, %v786_v21, 0.0  ;;  %v798_v25 = vsel %vm601_vm3, %v797_v12, 0.0  ;;  %v820_v34 = vsel %vm630_vm4, %v819_v23, 0.0  ;;  %v832_v27 = vsel %vm648_vm5, %v831_v30, 0.0 }
 0x416   : > { %v795_v31 = vmul.f32 %v1085_v20, %v787_v24  ;;  %v807_v33 = vmul.f32 %v1087_v22, %v798_v25  ;;  %v829_v39 = vmul.f32 %v1091_v26, %v820_v34  ;;  %v841_v41 = vmul.f32 %v1093_v37, %v832_v27 }
 0x418   : > { %v808_v35 = vadd.f32 %v807_v33, %v795_v31 }
 0x41a   : > { %v818_v38 = vadd.f32 %v817_v36, %v808_v35 }
 0x41c   : > { %v830_v40 = vadd.f32 %v829_v39, %v818_v38 }
 0x41e   : > { %v842_v42 = vadd.f32 %v841_v41, %v830_v40 }
 0x420   : > { %v850_v43 = vadd.f32 %v1094_v29, %v842_v42 }
 0x422   : > { %1129 = vmatmul.mubr.msk.f32.vlgmr.msra.gmra.mrb[0].mxu1 %vm553_vm0, %v850_v43 }
 0x4f5   : > { %v931_v45 = vpop.f32.mrb[0].mxu1 }
 0x4f6   : > { %v932_v32 = vadd.f32 %v1095_v44, %v931_v45  ;;  %v1130_v46 = vpop.f32.mrb[1].mxu1 }
 0x4f8   : > { %v935_v47 = vmax.f32 %v932_v32, 0.0 }
 0x4fa   : > { %v936_v48 = vadd.f32 %v935_v47, %v756_v61 }
 0x4fc   : > { %937 = vst.msk [vmem:[%s545_s10] sm:$0xff] %vm553_vm0, %v936_v48 }
 0x4fd PF: > { %p27_p6 = scmp.ge.s32.totalorder %s1704_s23, 4   ;;  %s1953_s29 = smov %s1448_s30 }
 0x4fe   : > { %s1954_s30 = smov %s1452_s15  ;;  %s1955_s15 = smov %s1715_s21 }
 0x4ff   : > { %s1956_s16 = smov %s1704_s23  ;;  %29 = sbr.rel (!%p27_p6) target bundleno = 12 (0xc), region = 144 }
 0x506   :  { %957 = vsyncpa [#allocation3], 1 }
 0x507   :  { %959 = vsyncpa [#allocation3 + $0x1], 1 }
 0x508   :  { %960 = vsyncpa [#allocation5], 1 }
 0x509   :  { %961 = vsyncpa [#allocation8], 1 }
 0x50a   :  { %962 = vsyncpa [#allocation11], 1 }

// kernel: encoder_block_forward.3
= control target key start
LH: loop header
LB: loop body
LE: loop exit
PB: predicated region body
PF: predicated region fallthrough
CT: control target
= control target key end

     0   :  { %s2147_s0 = inlined_call_operand.vmem [shape: f32[2,8,32], index: 0, kind: input, shape index: {}]   ;;  %s2148_s1 = inlined_call_operand.vmem [shape: f32[2,1,8], index: 1, kind: input, shape index: {}]   ;;  %s2149_s2 = inlined_call_operand.vmem [shape: f32[1,32], index: 2, kind: input, shape index: {}]   ;;  %s2150_s3 = inlined_call_operand.vmem [shape: f32[1,32], index: 3, kind: input, shape index: {}]   ;;  %s2151_s4 = inlined_call_operand.vmem [shape: f32[32,96], index: 4, kind: input, shape index: {}]   ;;  %s2152_s5 = inlined_call_operand.vmem [shape: f32[1,96], index: 5, kind: input, shape index: {}]   ;;  %s2153_s6 = inlined_call_operand.vmem [shape: f32[32,32], index: 6, kind: input, shape index: {}]   ;;  %s2154_s7 = inlined_call_operand.vmem [shape: f32[1,32], index: 7, kind: input, shape index: {}]   ;;  %s2155_s8 = inlined_call_operand.vmem [shape: f32[1,32], index: 8, kind: input, shape index: {}]   ;;  %s2156_s9 = inlined_call_operand.vmem [shape: f32[1,32], index: 9, kind: input, shape index: {}]   ;;  %s2157_s10 = inlined_call_operand.vmem [shape: f32[32,32], index: 10, kind: input, shape index: {}]   ;;  %s2158_s11 = inlined_call_operand.vmem [shape: f32[1,32], index: 11, kind: input, shape index: {}]   ;;  %s2159_s12 = inlined_call_operand.hbm [shape: f32[2,8,32], index: 12, kind: output, shape index: {}]  }
   0x1   :  { %2160 = sst [smem:[#allocation5_spill]] %s2147_s0 }
   0x2   :  { %2161 = sst [smem:[#allocation6_spill]] %s2148_s1 }
   0x3   :  { %17 = vsyncpa [#allocation3], 0 }
   0x4   :  { %19 = vsyncpa [#allocation3 + $0x1], 0  ;;  %s1895_s21 = smov 0   ;;  %s1897_s22 = smov 0  }
   0x5   :  { %s1899_s23 = smov 0   ;;  %s1901_s24 = smov 0  }
   0x6 LB: > { %s1916_s25 = sadd.s32 4294967295, %s1809_s24   ;;  %s1516_s26 = sadd.s32 4294967294, %s1809_s24   ;;  %s1809_s24 = sphi %s1901_s24, %s2169_s24   ;;  %s1805_s23 = sphi %s1899_s23, %s2168_s23   ;;  %s1801_s22 = sphi %s1897_s22, %s2167_s22   ;;  %s1797_s21 = sphi %s1895_s21, %s2166_s21  }
   0x7   : > { %s1920_s27 = sadd.s32 1, %s1809_s24   ;;  %s294_s28 = sadd.s32 1, %s1805_s23 }
   0x8   : > { %s291_s29 = ssub.s32 %s1809_s24, %s1920_s27  ;;  %p304_p0 = scmp.ne.s32.totalorder %s1805_s23, %s1801_s22 }
   0x9   : > { %p292_p1 = scmp.eq.s32.totalorder %s291_s29, 0  ;;  %p305_p2 = scmp.eq.s32.totalorder %s1916_s25, 1 }
   0xa   : > { %p310_p3 = scmp.ne.s32.totalorder %s1801_s22, %s1797_s21  ;;  %p311_p4 = scmp.eq.s32.totalorder %s1516_s26, 1 }
   0xb   : > { %s1931_s30 = scalar_select %p292_p1, %s1805_s23, %s294_s28  }
   0xc   : > { %p1933_p5 = por %p305_p2, %p304_p0  ;;  %p1937_p6 = por %p311_p4, %p310_p3 }
   0xd   : > { %p1519_p7 = scmp.ge.s32.totalorder %s1809_s24, 1  ;;  %p372_p8 = scmp.lt.s32.totalorder %s1809_s24, 3 }
   0xf   : > { %p373_p9 = pnand %p1519_p7, %p372_p8 }
  0x10   : > { %p416_p10 = scmp.lt.s32.totalorder (!%p373_p9), %s1916_s25, 1  ;;  %vm426_vm0 = vcmask (!%p373_p9), 261120   ;;  %s2164_s0 = sld [smem:[#allocation5_spill]] (!%p373_p9)  ;;  %v455_v7 = vld [vmem:[%s2151_s4] sm:$0xff] (!%p373_p9)  ;;  %v456_v8 = vld [vmem:[%s2151_s4 + $0x8] sm:$0xff] (!%p373_p9)  ;;  %v457_v9 = vld [vmem:[%s2151_s4 + $0x10] sm:$0xff] (!%p373_p9)  ;;  %v622_v35 = vlaneseq (!%p373_p9) }
  0x11   : > { %376 = sbr.rel (%p373_p9) target bundleno = 2309 (0x905), region = 68  ;;  %v1811_v10 = vmov (!%p373_p9), 0.0|0.0   ;;  %v1653_v11 = vpack.c.bf16 (!%p373_p9), %v456_v8, %v455_v7  ;;  %v458_v12 = vld [vmem:[%s2151_s4 + $0x18] sm:$0xff] (!%p373_p9)  ;;  %vm1812_vm1 = vmmov (!%p373_p9), 0   ;;  %v1813_v13 = vmov (!%p373_p9), 0.0   ;;  %s1814_s18 = smov (!%p373_p9), 120  }
  0x12   : > { %1652 = vmatprep.subr.bf16.mxu0 (!%p373_p9), %v1811_v10  ;;  %1587 = vmatprep.mubr.msk.f32.mxu0 (!%p373_p9), %vm1812_vm1, %v1813_v13  ;;  %v1656_v14 = vpack.c.bf16 (!%p373_p9), %v458_v12, %v457_v9  ;;  %v1522_v19 = vld [vmem:[%s2149_s2] ss:$0 sm:$0xff] (!%p373_p9)  ;;  %s1816_s20 = smov (!%p373_p9), 88   ;;  %s1817_s26 = smov (!%p373_p9), 80   ;;  %vm543_vm2 = vcmask (!%p373_p9), 64512   ;;  %v623_v37 = vshrl.u32 (!%p373_p9), %v622_v35, 7 }
  0x13   : > { %1590 = vmatprep.subr.mxu1 (!%p373_p9), %v1813_v13  ;;  %1592 = vmatprep.mubr.msk.f32.mxu1 (!%p373_p9), %vm1812_vm1, %v1813_v13  ;;  %v1523_v21 = vld [vmem:[%s2150_s3] ss:$0 sm:$0xff] (!%p373_p9)  ;;  %s1818_s28 = smov (!%p373_p9), 112   ;;  %s1819_s29 = smov (!%p373_p9), 72   ;;  %v1821_v39 = vmov (!%p373_p9), 0   ;;  %vm1229_vm5 = vcmask (!%p373_p9), 130048  }
  0x14   : > { %1654 = vmatpush3.bf16.msra.mxu0 (!%p373_p9), %v1653_v11  ;;  %v1524_v24 = vld [vmem:[%s2152_s5] ss:$0 sm:$0xff] (!%p373_p9)  ;;  %s2165_s1 = sld [smem:[#allocation6_spill]] (!%p373_p9)  ;;  %v624_v38 = vsub.s32 (!%p373_p9), 0, %v623_v37  ;;  %vm1231_vm6 = vcmask (!%p373_p9), 195584   ;;  %s1545_s17 = sshll.u32 (!%p373_p9), %s1916_s25, 7 }
  0x15   : > { %1655 = vmatprep.subr.bf16.mxu0 (!%p373_p9), %v1811_v10  ;;  %v1233_v37 = vld [vmem:[%s2153_s6] sm:$0xff] (!%p373_p9) }
  0x18   : > { %s1945_s15 = scalar_select %p416_p10, %s1916_s25, 1  ;;  %1657 = vmatpush3.bf16.msra.mxu0 %v1656_v14 }
  0x19   : > { %1600 = vmatprep.subr.mxu0 %v1813_v13  ;;  %s1829_s25 = smov [#allocation2]  }
  0x1a   : > { %s1521_s16 = sshll.u32 %s1945_s15, 3 }
  0x1b   : > { %s419_s19 = scalar_lea.vmem %s2164_s0, %s1521_s16  ;;  %s1820_s16 = smov 104  }
  0x1c   : > { %v1951_v0 = vld [vmem:[%s419_s19] sm:$0xff]  ;;  %s1815_s19 = smov 96   ;;  %s2104_s0 = scalar_lea.hbm %s2159_s12, %s1545_s17 }
  0x1d   : > { %v427_v1 = vsel %vm426_vm0, %v1951_v0, 0.0 }
  0x1e   : > { %428 = vadd.xlane.f32.xlu0 %v427_v1 }
  0xab   : > { %v429_v2 = vpop.xlane.xlu0 %428 }
  0xac   : > { %v431_v3 = vmul.f32 0.03125, %v429_v2 }
  0xae   : > { %v432_v4 = vsub.f32 %v1951_v0, %v431_v3 }
  0xb0   : > { %v433_v5 = vmul.f32 %v432_v4, %v432_v4 }
  0xb2   : > { %v434_v6 = vsel %vm426_vm0, %v433_v5, 0.0 }
  0xb3   : > { %435 = vadd.xlane.f32.xlu0 %v434_v6 }
 0x140   : > { %v436_v15 = vpop.xlane.xlu0 %435 }
 0x141   : > { %v437_v16 = vmul.f32 0.03125, %v436_v15 }
 0x143   : > { %v438_v17 = vadd.f32 1e-05, %v437_v16 }
 0x145   : > { %1727 = vrsqrt.f32 %v438_v17 }
 0x14f   : > { %v1728_v18 = vpop.eup %1727 }
 0x150   : > { %v440_v20 = vmul.f32 %v1728_v18, %v432_v4 }
 0x152   : > { %v447_v22 = vmul.f32 %v1522_v19, %v440_v20 }
 0x154   : > { %v454_v23 = vadd.f32 %v1523_v21, %v447_v22 }
 0x156   : > { %1588 = vmatmul.mubr.msk.f32.vlgmr.msra.gmra.mrb[0].mxu0 %vm426_vm0, %v454_v23 }
 0x157   : > { %1602 = vmatprep.mubr.msk.f32.mxu0 %vm1812_vm1, %v1813_v13 }
 0x229   : > { %v535_v25 = vpop.f32.mrb[0].mxu0 }
 0x22a   : > { %v1989_v26 = vadd.f32 %v1524_v24, %v535_v25  ;;  %v1589_v27 = vpop.f32.mrb[1].mxu0 }
 0x22c   : > { %715 = vrot.lane.b32.xlu0 %v1989_v26, %s1814_s18  ;;  %541 = vrot.lane.b32.xlu1 %v1989_v26, %s1815_s19  ;;  %s422_s19 = scalar_lea.vmem %s2165_s1, %s1945_s15  ;;  %s1822_s15 = smov 64  }
 0x22d   : > { %v539_v36 = vld [vmem:[%s422_s19] sm:$0x1] }
 0x22e   : > { %vm620_vm3 = vcmp.gt.f32.partialorder %v539_v36, 0.0 }
 0x22f   : > { %v621_v40 = vsel %vm620_vm3, 1, %v1821_v39 }
 0x230   : > { %717 = vrot.lane.b32.xlu1 %v1989_v26, %s1816_s20  ;;  %v625_v41 = vrot.slane %v621_v40, %v624_v38  ;;  %s1823_s20 = smov 48   ;;  %v1234_v38 = vld [vmem:[%s2153_s6 + $0x8] sm:$0xff] }
 0x231   : > { %v1659_v39 = vpack.c.bf16 %v1234_v38, %v1233_v37 }
 0x232   : > { %vm626_vm4 = vcmp.eq.s32.totalorder %v625_v41, 1 }
 0x234   : > { %884 = vrot.lane.b32.xlu1 %v1989_v26, %s1817_s26  ;;  %s1824_s26 = smov 40  }
 0x238   : > { %882 = vrot.lane.b32.xlu1 %v1989_v26, %s1818_s28  ;;  %s1825_s28 = smov 56  }
 0x23c   : > { %1051 = vrot.lane.b32.xlu1 %v1989_v26, %s1819_s29  ;;  %s1827_s29 = smov 16  }
 0x240   : > { %1049 = vrot.lane.b32.xlu1 %v1989_v26, %s1820_s16  ;;  %s1828_s16 = smov 24  }
 0x29e   : > { %v542_v28 = vpop.permute.xlu1 %541  ;;  %v716_v30 = vpop.permute.xlu0 %715 }
 0x29f   : > { %1591 = vmatpush3.xpose.msk.msra.mxu1 %vm543_vm2, %v542_v28 }
 0x2a0   : > { %1595 = vmatprep.subr.mxu1 %v1813_v13 }
 0x2a2   : > { %1593 = vmatmul.mubr.msk.f32.vlgmr.msra.gmra.mrb[0].mxu1 %vm543_vm2, %v1989_v26  ;;  %v718_v29 = vpop.permute.xlu1 %717 }
 0x2a3   : > { %1601 = vmatpush3.xpose.msk.msra.mxu0 %vm543_vm2, %v718_v29  ;;  %1597 = vmatprep.mubr.msk.f32.mxu1 %vm1812_vm1, %v1813_v13 }
 0x2a4   : > { %1610 = vmatprep.subr.mxu0 %v1813_v13 }
 0x2a6   : > { %1603 = vmatmul.mubr.msk.f32.vlgmr.msra.gmra.mrb[2].mxu0 %vm543_vm2, %v716_v30  ;;  %v885_v31 = vpop.permute.xlu1 %884 }
 0x2a7   : > { %1611 = vmatpush3.xpose.msk.msra.mxu0 %vm543_vm2, %v885_v31  ;;  %1612 = vmatprep.mubr.msk.f32.mxu0 %vm1812_vm1, %v1813_v13 }
 0x2a8   : > { %1620 = vmatprep.subr.mxu0 %v1813_v13 }
 0x2aa   : > { %v883_v32 = vpop.permute.xlu1 %882 }
 0x2ab   : > { %1613 = vmatmul.mubr.msk.f32.vlgmr.msra.gmra.mrb[4].mxu0 %vm543_vm2, %v883_v32 }
 0x2ac   : > { %1622 = vmatprep.mubr.msk.f32.mxu0 %vm1812_vm1, %v1813_v13 }
 0x2ae   : > { %v1052_v33 = vpop.permute.xlu1 %1051 }
 0x2af   : > { %1621 = vmatpush3.xpose.msk.msra.mxu0 %vm543_vm2, %v1052_v33 }
 0x2b0   : > { %1658 = vmatprep.subr.bf16.mxu0 %v1811_v10 }
 0x2b2   : > { %v1050_v34 = vpop.permute.xlu1 %1049 }
 0x2b3   : > { %1623 = vmatmul.mubr.msk.f32.vlgmr.msra.gmra.mrb[6].mxu0 %vm543_vm2, %v1050_v34 }
 0x2b4   : > { %1638 = vmatprep.mubr.msk.f32.mxu0 %vm1812_vm1, %v1813_v13  ;;  %1660 = vmatpush3.bf16.msra.mxu0 %v1659_v39 }
 0x2b5   : > { %1661 = vmatprep.subr.bf16.mxu0 %v1811_v10 }
 0x375   : > { %v614_v42 = vpop.f32.mrb[0].mxu1 }
 0x376   : > { %v619_v43 = vmul.f32 0.35355338, %v614_v42  ;;  %v1594_v44 = vpop.f32.mrb[1].mxu1  ;;  %v1235_v42 = vld [vmem:[%s2153_s6 + $0x10] sm:$0xff] }
 0x378   : > { %v627_v45 = vsel %vm626_vm4, %v619_v43, -1e+30 }
 0x379   : > { %v789_v46 = vpop.f32.mrb[2].mxu0  ;;  %v628_v47 = vsel %vm543_vm2, %v627_v45, -inf }
 0x37a   : > { %v793_v48 = vmul.f32 0.35355338, %v789_v46  ;;  %629 = vmax.xlane.f32.xlu1 %v628_v47  ;;  %v1604_v49 = vpop.f32.mrb[3].mxu0 }
 0x37c   : > { %v794_v50 = vsel %vm626_vm4, %v793_v48, -1e+30 }
 0x37d   : > { %v795_v51 = vsel %vm543_vm2, %v794_v50, -inf }
 0x37e   : > { %796 = vmax.xlane.f32.xlu0 %v795_v51  ;;  %v956_v52 = vpop.f32.mrb[4].mxu0 }
 0x37f   : > { %v960_v53 = vmul.f32 0.35355338, %v956_v52  ;;  %v1614_v54 = vpop.f32.mrb[5].mxu0 }
 0x381   : > { %v961_v55 = vsel %vm626_vm4, %v960_v53, -1e+30 }
 0x382   : > { %v962_v56 = vsel %vm543_vm2, %v961_v55, -inf }
 0x383   : > { %963 = vmax.xlane.f32.xlu1 %v962_v56  ;;  %v1538_v56 = vld [vmem:[%s2154_s7] ss:$0 sm:$0xff] }
 0x386   : > { %v1123_v57 = vpop.f32.mrb[6].mxu0 }
 0x387   : > { %v1127_v58 = vmul.f32 0.35355338, %v1123_v57  ;;  %v1624_v59 = vpop.f32.mrb[7].mxu0 }
 0x389   : > { %v1128_v60 = vsel %vm626_vm4, %v1127_v58, -1e+30 }
 0x38a   : > { %v1129_v61 = vsel %vm543_vm2, %v1128_v60, -inf }
 0x38b   : > { %1130 = vmax.xlane.f32.xlu0 %v1129_v61 }
 0x394   : > { %639 = vrot.lane.b32.xlu1 %v1989_v26, %s1822_s15 }
 0x407   : > { %v630_v62 = vpop.xlane.xlu1 %629 }
 0x408   : > { %v631_v63 = vsub.f32 %v627_v45, %v630_v62 }
 0x40a   : > { %v632_v1 = vmul.f32 1.442695, %v631_v63 }
 0x40b   : > { %v797_v2 = vpop.xlane.xlu0 %796 }
 0x40c   : > { %1729 = vpow2.f32 %v632_v1  ;;  %v798_v3 = vsub.f32 %v794_v50, %v797_v2 }
 0x40e   : > { %v799_v4 = vmul.f32 1.442695, %v798_v3 }
 0x410   : > { %1731 = vpow2.f32 %v799_v4  ;;  %v964_v5 = vpop.xlane.xlu1 %963  ;;  %v1347_v4 = vld [vmem:[%s2157_s10] sm:$0xff] }
 0x411   : > { %v965_v6 = vsub.f32 %v961_v55, %v964_v5  ;;  %v1348_v5 = vld [vmem:[%s2157_s10 + $0x8] sm:$0xff] }
 0x413   : > { %v966_v7 = vmul.f32 1.442695, %v965_v6  ;;  %v1665_v6 = vpack.c.bf16 %v1348_v5, %v1347_v4 }
 0x414   : > { %v640_v8 = vpop.permute.xlu1 %639 }
 0x415   : > { %1733 = vpow2.f32 %v966_v7  ;;  %1596 = vmatpush3.msra.mxu1 %v640_v8  ;;  %v1350_v7 = vld [vmem:[%s2157_s10 + $0x18] sm:$0xff] }
 0x416   : > { %v1730_v9 = vpop.eup %1729  ;;  %1605 = vmatprep.subr.mxu1 %v1813_v13 }
 0x417   : > { %v634_v11 = vsel %vm543_vm2, %v1730_v9, 0.0 }
 0x418   : > { %635 = vadd.xlane.f32.xlu1 %v634_v11  ;;  %v1131_v12 = vpop.xlane.xlu0 %1130 }
 0x419   : > { %v1132_v14 = vsub.f32 %v1128_v60, %v1131_v12 }
 0x41a   : > { %v1732_v15 = vpop.eup %1731 }
 0x41b   : > { %v1133_v16 = vmul.f32 1.442695, %v1132_v14  ;;  %v801_v17 = vsel %vm543_vm2, %v1732_v15, 0.0 }
 0x41c   : > { %802 = vadd.xlane.f32.xlu0 %v801_v17 }
 0x41d   : > { %1735 = vpow2.f32 %v1133_v16  ;;  %v1541_v16 = vld [vmem:[%s2156_s9] ss:$0 sm:$0xff] }
 0x41f   : > { %v1734_v18 = vpop.eup %1733 }
 0x420   : > { %v968_v19 = vsel %vm543_vm2, %v1734_v18, 0.0 }
 0x421   : > { %969 = vadd.xlane.f32.xlu1 %v968_v19  ;;  %v1542_v19 = vld [vmem:[%s2158_s11] ss:$0 sm:$0xff] }
 0x427   : > { %v1736_v20 = vpop.eup %1735 }
 0x428   : > { %v1135_v21 = vsel %vm543_vm2, %v1736_v20, 0.0 }
 0x429   : > { %1136 = vadd.xlane.f32.xlu0 %v1135_v21 }
 0x432   : > { %973 = vrot.lane.b32.xlu1 %v1989_v26, %s1823_s20 }
 0x436   : > { %1140 = vrot.lane.b32.xlu1 %v1989_v26, %s1824_s26  ;;  %s413_s26 = sand.u32 1, %s1801_s22  }
 0x43f   : > { %806 = vrot.lane.b32.xlu0 %v1989_v26, %s1825_s28  ;;  %s1826_s28 = smov 8  }
 0x4a5   : > { %v636_v22 = vpop.xlane.xlu1 %635 }
 0x4a6   : > { %1737 = vrcp.f32 %v636_v22 }
 0x4a9   : > { %v803_v23 = vpop.xlane.xlu0 %802 }
 0x4aa   : > { %1739 = vrcp.f32 %v803_v23 }
 0x4ae   : > { %v970_v24 = vpop.xlane.xlu1 %969 }
 0x4af   : > { %1741 = vrcp.f32 %v970_v24 }
 0x4b0   : > { %v1738_v25 = vpop.eup %1737 }
 0x4b1   : > { %v638_v27 = vmul.f32 %v1738_v25, %v1730_v9 }
 0x4b2   : > { %v974_v31 = vpop.permute.xlu1 %973 }
 0x4b3   : > { %1598 = vmatmul.mubr.msk.f32.vlgmr.msra.gmra.mrb[2].mxu1 %vm543_vm2, %v638_v27 }
 0x4b4   : > { %1607 = vmatprep.mubr.msk.f32.mxu1 %vm1812_vm1, %v1813_v13  ;;  %v1740_v29 = vpop.eup %1739 }
 0x4b5   : > { %v805_v30 = vmul.f32 %v1740_v29, %v1732_v15 }
 0x4b6   : > { %v1137_v28 = vpop.xlane.xlu0 %1136  ;;  %v1141_v34 = vpop.permute.xlu1 %1140 }
 0x4b7   : > { %1743 = vrcp.f32 %v1137_v28 }
 0x4b9   : > { %v1742_v26 = vpop.eup %1741 }
 0x4ba   : > { %v807_v32 = vpop.permute.xlu0 %806  ;;  %v972_v33 = vmul.f32 %v1742_v26, %v1734_v18 }
 0x4bb   : > { %1606 = vmatpush3.msra.mxu1 %v807_v32 }
 0x4bc   : > { %1608 = vmatmul.mubr.msk.f32.vlgmr.msra.gmra.mrb[4].mxu1 %vm543_vm2, %v805_v30  ;;  %1615 = vmatprep.subr.mxu1 %v1813_v13 }
 0x4bd   : > { %1616 = vmatpush3.msra.mxu1 %v974_v31  ;;  %1617 = vmatprep.mubr.msk.f32.mxu1 %vm1812_vm1, %v1813_v13 }
 0x4be   : > { %1625 = vmatprep.subr.mxu1 %v1813_v13 }
 0x4c0   : > { %1618 = vmatmul.mubr.msk.f32.vlgmr.msra.gmra.mrb[6].mxu1 %vm543_vm2, %v972_v33 }
 0x4c1   : > { %v1744_v35 = vpop.eup %1743  ;;  %1626 = vmatpush3.msra.mxu1 %v1141_v34  ;;  %1627 = vmatprep.mubr.msk.f32.mxu1 %vm1812_vm1, %v1813_v13 }
 0x4c2   : > { %v1139_v36 = vmul.f32 %v1744_v35, %v1736_v20  ;;  %1664 = vmatprep.subr.bf16.mxu1 %v1811_v10 }
 0x4c4   : > { %1628 = vmatmul.mubr.msk.f32.vlgmr.msra.gmra.mrb[8].mxu1 %vm543_vm2, %v1139_v36 }
 0x4c5   : > { %1649 = vmatprep.mubr.msk.f32.mxu1 %vm1812_vm1, %v1813_v13  ;;  %v1236_v13 = vld [vmem:[%s2153_s6 + $0x18] sm:$0xff]  ;;  %1666 = vmatpush3.bf16.msra.mxu1 %v1665_v6 }
 0x4c6   : > { %v1662_v43 = vpack.c.bf16 %v1236_v13, %v1235_v42  ;;  %1667 = vmatprep.subr.bf16.mxu1 %v1811_v10  ;;  %v1540_v10 = vld [vmem:[%s2155_s8] ss:$0 sm:$0xff] }
 0x4c8   : > { %1663 = vmatpush3.bf16.msra.mxu0 %v1662_v43 }
 0x586   : > { %v711_v40 = vpop.f32.mrb[2].mxu1 }
 0x587   : > { %v1599_v41 = vpop.f32.mrb[3].mxu1 }
 0x58f   : > { %v878_v44 = vpop.f32.mrb[4].mxu1 }
 0x590   : > { %1217 = vrot.lane.b32.xlu0 %v878_v44, %s1826_s28  ;;  %v1609_v45 = vpop.f32.mrb[5].mxu1  ;;  %s1520_s28 = sshll.u32 %s413_s26, 3 }
 0x591   : > { %s415_s18 = scalar_lea.vmem [#allocation2], %s1520_s28  ;;  %s1751_s28 = sshll.u32 %s1829_s25, 4  ;;  %s1752_s28 = int_to_ptr.vmem [resolvable:$false] %s1751_s28 }
 0x592   : > { %s1448_s19 = sshll.u32 %s415_s18, 4  ;;  %s1753_s1 = scalar_lea.vmem %s1752_s28, 256  ;;  %s2106_s19 = int_to_ptr.vmem [resolvable:$true] %s1448_s19 }
 0x593   : > { %v1045_v46 = vpop.f32.mrb[6].mxu1  ;;  %p1754_p0 = scmp.lt.s32.totalorder %s2106_s19, %s1752_s28 }
 0x594   : > { %1221 = vrot.lane.b32.xlu1 %v1045_v46, %s1827_s29  ;;  %v1619_v47 = vpop.f32.mrb[7].mxu1  ;;  %s1435_s29 = scalar_lea.sflag [#allocation3], %s413_s26 }
 0x597   : > { %v1212_v48 = vpop.f32.mrb[8].mxu1 }
 0x598   : > { %1225 = vrot.lane.b32.xlu0 %v1212_v48, %s1828_s16  ;;  %v1629_v49 = vpop.f32.mrb[9].mxu1  ;;  %s1747_s16 = scalar_lea.vmem %s2106_s19, 128 }
 0x599   : > { %p1748_p11 = scmp.ne.s32.totalorder %s2106_s19, %s1747_s16  ;;  %p1755_p1 = scmp.lt.s32.totalorder %s1753_s1, %s1747_s16 }
 0x59b   : > { %p1749_p12 = pnand %p1748_p11, %p1933_p5  ;;  %p1756_p2 = por %p1755_p1, %p1754_p0 }
 0x59d   : > { %p1750_p13 = pneg %p1749_p12 }
 0x59f   : > { %p1757_p3 = pnand %p1756_p2, %p1750_p13 }
 0x602   : > { %v1218_v50 = vpop.permute.xlu0 %1217 }
 0x603   : > { %v1228_v52 = vsel %vm543_vm2, %v711_v40, %v1218_v50 }
 0x606   : > { %v1222_v51 = vpop.permute.xlu1 %1221 }
 0x607   : > { %v1230_v53 = vsel %vm1229_vm5, %v1228_v52, %v1222_v51 }
 0x60a   : > { %v1226_v54 = vpop.permute.xlu0 %1225 }
 0x60b   : > { %v1232_v55 = vsel %vm1231_vm6, %v1230_v53, %v1226_v54 }
 0x60c   : > { %1639 = vmatmul.mubr.msk.f32.vlgmr.msra.gmra.mrb[8].mxu0 %vm426_vm0, %v1232_v55 }
 0x6df   : > { %v1313_v57 = vpop.f32.mrb[8].mxu0 }
 0x6e0   : > { %v1314_v58 = vadd.f32 %v1538_v56, %v1313_v57  ;;  %v1640_v59 = vpop.f32.mrb[9].mxu0 }
 0x6e2   : > { %v1317_v60 = vadd.f32 %v1314_v58, %v1951_v0  ;;  %v1349_v0 = vld [vmem:[%s2157_s10 + $0x10] sm:$0xff] }
 0x6e3   : > { %v1668_v8 = vpack.c.bf16 %v1350_v7, %v1349_v0 }
 0x6e4   : > { %v1320_v61 = vsel %vm426_vm0, %v1317_v60, 0.0 }
 0x6e5   : > { %1321 = vadd.xlane.f32.xlu1 %v1320_v61  ;;  %1669 = vmatpush3.bf16.msra.mxu1 %v1668_v8 }
 0x772   : > { %v1322_v62 = vpop.xlane.xlu1 %1321 }
 0x773   : > { %v1323_v63 = vmul.f32 0.03125, %v1322_v62 }
 0x775   : > { %v1324_v1 = vsub.f32 %v1317_v60, %v1323_v63 }
 0x777   : > { %v1325_v2 = vmul.f32 %v1324_v1, %v1324_v1 }
 0x779   : > { %v1326_v3 = vsel %vm426_vm0, %v1325_v2, 0.0 }
 0x77a   : > { %1327 = vadd.xlane.f32.xlu0 %v1326_v3 }
 0x807   : > { %v1328_v9 = vpop.xlane.xlu0 %1327 }
 0x808   : > { %v1329_v11 = vmul.f32 0.03125, %v1328_v9 }
 0x80a   : > { %v1330_v12 = vadd.f32 1e-05, %v1329_v11 }
 0x80c   : > { %1745 = vrsqrt.f32 %v1330_v12 }
 0x816   : > { %v1746_v14 = vpop.eup %1745 }
 0x817   : > { %v1332_v15 = vmul.f32 %v1746_v14, %v1324_v1 }
 0x819   : > { %v1339_v17 = vmul.f32 %v1540_v10, %v1332_v15 }
 0x81b   : > { %v1346_v18 = vadd.f32 %v1541_v16, %v1339_v17 }
 0x81d   : > { %1650 = vmatmul.mubr.msk.f32.vlgmr.msra.gmra.mrb[10].mxu1 %vm426_vm0, %v1346_v18 }
 0x8f0   : > { %v1427_v20 = vpop.f32.mrb[10].mxu1 }
 0x8f1   : > { %v1428_v21 = vadd.f32 %v1542_v19, %v1427_v20  ;;  %v1651_v22 = vpop.f32.mrb[11].mxu1 }
 0x8f3   : > { %v1431_v23 = vmax.f32 %v1428_v21, 0.0 }
 0x8f5   : > { %v1432_v24 = vadd.f32 %v1431_v23, %v1317_v60 }
 0x8f7   : > { %1433 = vst.msk [vmem:[%s415_s18] sm:$0xff] %vm426_vm0, %v1432_v24 }
 0x8f8   : > { %1760 = shalt.err (!%p1757_p3)
}
 0x8f9   : > { %s1761_s26 = scalar_lea.hbm %s2104_s0, 128  ;;  %s1765_s15 = scalar_lea.hbm %s2159_s12, 256 }
 0x8fa   : > { %p1762_p4 = scmp.ne.s32.totalorder %s2104_s0, %s1761_s26  ;;  %p1766_p9 = scmp.lt.u32.totalorder %s2104_s0, %s2159_s12 }
 0x8fb   : > { %p1767_p10 = scmp.lt.u32.totalorder %s1765_s15, %s1761_s26  ;;  %p1769_p12 = scmp.lt.u32.totalorder %s1761_s26, %s2104_s0 }
 0x8fc   : > { %p1763_p7 = pnand %p1762_p4, %p1933_p5 }
 0x8fd   : > { %p1768_p11 = por %p1767_p10, %p1766_p9 }
 0x8fe   : > { %p1764_p8 = pneg %p1763_p7 }
 0x8ff   : > { %p1770_p13 = por %p1769_p12, %p1768_p11 }
 0x901   : > { %p1771_p0 = pnand %p1770_p13, %p1764_p8 }
 0x903   : > { %1774 = shalt.err (!%p1771_p0)
}
 0x904   : > { %1670 = dma.vmem_to_hbm [thread:$0]  (%p1933_p5), %s2106_s19, 128, %s2104_s0, %s1435_s29  }
 0x905 PF: > { %p1676_p1 = scmp.ge.s32.totalorder %s1809_s24, 2  ;;  %s1460_s1 = sand.u32 1, %s1797_s21  }
 0x906   : > { %s1461_s16 = scalar_lea.sflag [#allocation3], %s1460_s1 }
 0x907   : > { %p1673_p2 = pnand %p1676_p1, %p1937_p6 }
 0x909   : > { %1792 = dma.done.wait (!%p1673_p2), %s1461_s16, 128  }
 0x90a   : > { %1794 = vsyncadd (!%p1673_p2), %s1461_s16, 4294967168  ;;  %p22_p3 = scmp.ge.s32.totalorder %s1920_s27, 4   ;;  %s2166_s21 = smov %s1801_s22 }
 0x90b   : > { %s2167_s22 = smov %s1805_s23  ;;  %s2168_s23 = smov %s1931_s30 }
 0x90c   : > { %s2169_s24 = smov %s1920_s27  ;;  %24 = sbr.rel (!%p22_p3) target bundleno = 6 (0x6), region = 106 }
 0x913   :  { %1466 = vsyncpa [#allocation3], 1 }
 0x914   :  { %1468 = vsyncpa [#allocation3 + $0x1], 1 }

</bundles_post_ra>
